<compile_context>
chip_gen: v7x
topology: tpu7x:2x2x1
jax: 0.10.0
libtpu: 0.0.40
codegen_flags: <defaults>
</compile_context>

<pallas_src>
import functools
import math

import jax
import jax.numpy as jnp
from jax.experimental import pallas as pl

NEG_INF = -1.0e9   # matches scores.masked_fill_(attn_mask, -1000000000.0)
LN_EPS = 1e-5      # PyTorch nn.LayerNorm default; the reference builds a fresh
                   # LayerNorm in forward() -> gamma=1, beta=0 always.


def _layer_norm(x):
    mean = jnp.mean(x, axis=-1, keepdims=True)
    var = jnp.mean((x - mean) ** 2, axis=-1, keepdims=True)
    return (x - mean) * jax.lax.rsqrt(var + LN_EPS)


# ------------------------------ Pallas kernel ------------------------------ #

def encoder_layer_kernel(x_ref, mask_ref, wqkv_ref, wo_ref, w1_ref, w2_ref,
                         out_ref, attn_ref, *, n_heads, d_k, d_v, batch,
                         seq_len):
    """One full EncoderLayer (self-attn + FFN, each with residual+LayerNorm).

    x_ref    : [B*L, d_model]              activations (also the residual)
    mask_ref : [H*B, L, L]                 additive mask (0 or NEG_INF)
    wqkv_ref : [H, d_model, 2*d_k + d_v]   fused per-head Q|K|V projection
    wo_ref   : [H, d_v, d_model]           per-head output projection
    w1_ref   : [d_model, d_ff]
    w2_ref   : [d_ff, d_model]
    out_ref  : [B*L, d_model]
    attn_ref : [H*B, L, L]                 softmax attention probabilities
    """
    H, B, L = n_heads, batch, seq_len
    N = B * L
    d_model = x_ref.shape[-1]

    x = x_ref[...]                                              # [N, D] f32
    mask = mask_ref[...]                                        # [H*B, L, L]

    # ---- fused Q/K/V projection: one head-batched matmul (single MXU stage) --
    x_b = jnp.broadcast_to(x[None], (H, N, d_model))            # [H, N, D]
    qkv = jnp.einsum('hnd,hde->hne', x_b, wqkv_ref[...],
                     preferred_element_type=jnp.float32)        # [H, N, 2dk+dv]
    scale = 1.0 / math.sqrt(d_k)
    q = (qkv[:, :, :d_k] * scale).reshape(H * B, L, d_k)
    k = qkv[:, :, d_k:2 * d_k].reshape(H * B, L, d_k)
    v = qkv[:, :, 2 * d_k:].reshape(H * B, L, d_v)

    # ---- scaled dot-product attention, batched over (head, batch) ----------
    scores = jnp.einsum('nqd,nkd->nqk', q, k,
                        preferred_element_type=jnp.float32) + mask
    scores = scores - jnp.max(scores, axis=-1, keepdims=True)
    e = jnp.exp(scores)
    attn = e * pl.reciprocal(jnp.sum(e, axis=-1, keepdims=True), approx=True)
    attn_ref[...] = attn

    ctx = jnp.einsum('nqk,nkd->nqd', attn, v,
                     preferred_element_type=jnp.float32)        # [H*B, L, dv]

    # ---- output projection: per-head partials summed over heads ------------
    ctx_h = ctx.reshape(H, N, d_v)
    partial = jnp.einsum('hnd,hde->hne', ctx_h, wo_ref[...],
                         preferred_element_type=jnp.float32)    # [H, N, D]
    y = _layer_norm(jnp.sum(partial, axis=0) + x)               # residual + LN

    # ---- position-wise FFN + residual + LayerNorm ---------------------------
    h1 = jnp.maximum(jnp.dot(y, w1_ref[...],
                             preferred_element_type=jnp.float32), 0.0)
    ffn = jnp.dot(h1, w2_ref[...], preferred_element_type=jnp.float32)
    out_ref[...] = _layer_norm(ffn + y)


# ------------------------------ Pallas wrapper ------------------------------ #

def encoder_layer(x2d, mask_hb, wqkv_h, wo_h, w1, w2, *, n_heads, d_k, d_v,
                  batch, seq_len):
    N, d_model = x2d.shape
    d_ff = w1.shape[-1]

    flops = (2 * N * d_model * n_heads * (2 * d_k + d_v)      # fused QKV proj
             + 2 * n_heads * batch * seq_len * seq_len * (d_k + d_v)
             + 2 * N * n_heads * d_v * d_model                # output proj
             + 4 * N * d_model * d_ff)                        # FFN
    bytes_accessed = 4 * (x2d.size + mask_hb.size + wqkv_h.size + wo_h.size
                          + w1.size + w2.size + N * d_model
                          + n_heads * batch * seq_len * seq_len)

    kernel = functools.partial(encoder_layer_kernel, n_heads=n_heads, d_k=d_k,
                               d_v=d_v, batch=batch, seq_len=seq_len)
    # No grid: single invocation, whole arrays resident in VMEM (tiny shapes).
    out, attn = pl.pallas_call(
        kernel,
        out_shape=(
            jax.ShapeDtypeStruct((N, d_model), jnp.float32),
            jax.ShapeDtypeStruct((n_heads * batch, seq_len, seq_len),
                                 jnp.float32),
        ),
        cost_estimate=pl.CostEstimate(
            flops=flops,
            transcendentals=n_heads * batch * seq_len * seq_len,
            bytes_accessed=bytes_accessed),
    )(x2d, mask_hb, wqkv_h, wo_h, w1, w2)
    return out, attn


# ------------------------------ Encoder glue -------------------------------- #

def positional_encoding_table(max_len, d_model):
    position = jnp.arange(max_len, dtype=jnp.float32)[:, None]
    div_term = jnp.exp(jnp.arange(0, d_model, 2, dtype=jnp.float32)
                       * (-math.log(10000.0) / d_model))
    pe = jnp.zeros((max_len, d_model), dtype=jnp.float32)
    pe = pe.at[:, 0::2].set(jnp.sin(position * div_term))
    pe = pe.at[:, 1::2].set(jnp.cos(position * div_term))
    return pe                                                  # [max_len, D]


def init_encoder_params(key, src_vocab_size, d_model, d_ff, d_k, d_v, n_heads,
                        n_layers):
    """Raw parameters in torch layout (nn.Linear weight = [out, in])."""
    n_per_layer = 6
    keys = jax.random.split(key, 1 + n_layers * n_per_layer)
    params = {"emb": jax.random.normal(keys[0], (src_vocab_size, d_model),
                                       jnp.float32) * 0.02}
    layers = []
    for li in range(n_layers):
        k = keys[1 + li * n_per_layer: 1 + (li + 1) * n_per_layer]
        layers.append({
            "W_Q": jax.random.normal(k[0], (n_heads * d_k, d_model)) * 0.05,
            "W_K": jax.random.normal(k[1], (n_heads * d_k, d_model)) * 0.05,
            "W_V": jax.random.normal(k[2], (n_heads * d_v, d_model)) * 0.05,
            "W_O": jax.random.normal(k[3], (d_model, n_heads * d_v)) * 0.05,
            "W_1": jax.random.normal(k[4], (d_ff, d_model)) * 0.05,
            "W_2": jax.random.normal(k[5], (d_model, d_ff)) * 0.05,
        })
    params["layers"] = layers
    return params


def prepare_encoder_params(raw, *, d_model, d_k, d_v, n_heads):
    """One-time conversion of torch-layout weights to fused kernel layouts."""
    prepped = {"emb": raw["emb"], "layers": []}
    for lw in raw["layers"]:
        wq = lw["W_Q"].T.reshape(d_model, n_heads, d_k).transpose(1, 0, 2)
        wk = lw["W_K"].T.reshape(d_model, n_heads, d_k).transpose(1, 0, 2)
        wv = lw["W_V"].T.reshape(d_model, n_heads, d_v).transpose(1, 0, 2)
        prepped["layers"].append({
            "wqkv_h": jnp.concatenate([wq, wk, wv], axis=-1),   # [H, D, 2dk+dv]
            "wo_h": lw["W_O"].T.reshape(n_heads, d_v, d_model), # [H, dv, D]
            "w1": lw["W_1"].T,                                  # [D, d_ff]
            "w2": lw["W_2"].T,                                  # [d_ff, D]
        })
    return prepped


def encoder_forward(params, enc_inputs, pe_table, *, d_model, d_k, d_v,
                    n_heads):
    B, L = enc_inputs.shape

    # Embedding + positional encoding (dropout = identity / eval mode).
    x = jnp.take(params["emb"], enc_inputs, axis=0)            # [B, L, D]
    x = x + pe_table[:L][None, :, :]

    # Pad attention mask (key token == 0), built once as an ADDITIVE mask and
    # broadcast over heads; reused by every layer.
    pad = (enc_inputs == 0)                                    # [B, L]
    add = jnp.where(pad[:, None, :], NEG_INF, 0.0).astype(jnp.float32)
    add = jnp.broadcast_to(add, (B, L, L))
    mask_hb = jnp.broadcast_to(add[None], (n_heads, B, L, L)
                               ).reshape(n_heads * B, L, L)

    x2d = x.reshape(B * L, d_model)
    enc_self_attns = []
    for lw in params["layers"]:
        x2d, attn_hb = encoder_layer(
            x2d, mask_hb, lw["wqkv_h"], lw["wo_h"], lw["w1"], lw["w2"],
            n_heads=n_heads, d_k=d_k, d_v=d_v, batch=B, seq_len=L)
        attn = attn_hb.reshape(n_heads, B, L, L).transpose(1, 0, 2, 3)
        enc_self_attns.append(attn)                            # [B, H, L, L]

    return x2d.reshape(B, L, d_model), enc_self_attns


# ---------------------------------- main ------------------------------------ #

if __name__ == "__main__":
    src_vocab_size = 16
    d_model, d_ff = 32, 64
    d_k = d_v = 8
    n_heads, n_layers = 4, 2
    B, src_len = 2, 8

    key = jax.random.PRNGKey(0)
    k_par, k_inp = jax.random.split(key)

    raw = init_encoder_params(k_par, src_vocab_size, d_model, d_ff, d_k, d_v,
                              n_heads, n_layers)
    params = prepare_encoder_params(raw, d_model=d_model, d_k=d_k, d_v=d_v,
                                    n_heads=n_heads)

    enc_inputs = jax.random.randint(k_inp, (B, src_len), 1, src_vocab_size,
                                    dtype=jnp.int32)
    enc_inputs = enc_inputs.at[:, -2:].set(0)   # pad tokens -> exercise mask

    pe_table = positional_encoding_table(5000, d_model)   # built once, hoisted

    fwd = jax.jit(functools.partial(encoder_forward, d_model=d_model, d_k=d_k,
                                    d_v=d_v, n_heads=n_heads))
    enc_out, enc_self_attns = fwd(params, enc_inputs, pe_table)

    enc_out = jax.block_until_ready(enc_out)
    for a in enc_self_attns:
        jax.block_until_ready(a)

    assert enc_out.shape == (B, src_len, d_model)
    assert len(enc_self_attns) == n_layers
    assert enc_self_attns[0].shape == (B, n_heads, src_len, src_len)
    assert bool(jnp.all(jnp.isfinite(enc_out)))
    # softmax rows (over non-pad keys) should sum to ~1 (approx reciprocal)
    assert bool(jnp.all(jnp.abs(jnp.sum(enc_self_attns[0], axis=-1) - 1.0)
                        < 1e-2))
    print("KERNEL_OK")
</pallas_src>

<mosaic_0001>
module attributes {stable_mosaic.version = 11 : i64} {
  func.func @encoder_layer_kernel(%arg0: memref<16x32xf32, #tpu.memory_space<vmem>>, %arg1: memref<8x8x8xf32, #tpu.memory_space<vmem>>, %arg2: memref<4x32x24xf32, #tpu.memory_space<vmem>>, %arg3: memref<4x8x32xf32, #tpu.memory_space<vmem>>, %arg4: memref<32x64xf32, #tpu.memory_space<vmem>>, %arg5: memref<64x32xf32, #tpu.memory_space<vmem>>, %arg6: memref<16x32xf32, #tpu.memory_space<vmem>>, %arg7: memref<8x8x8xf32, #tpu.memory_space<vmem>>) attributes {dimension_semantics = [], scalar_prefetch = 0 : i64, scratch_operands = 0 : i64, tpu.core_type = #tpu.core_type<tc>} {
    %c0 = arith.constant 0 : index
    %c0_0 = arith.constant 0 : index
    %0 = vector.load %arg0[%c0, %c0_0] : memref<16x32xf32, #tpu.memory_space<vmem>>, vector<16x32xf32>
    %c0_1 = arith.constant 0 : index
    %c0_2 = arith.constant 0 : index
    %c0_3 = arith.constant 0 : index
    %1 = vector.load %arg1[%c0_1, %c0_2, %c0_3] : memref<8x8x8xf32, #tpu.memory_space<vmem>>, vector<8x8x8xf32>
    %2 = vector.shape_cast %0 : vector<16x32xf32> to vector<1x16x32xf32>
    %3 = vector.shape_cast %2 : vector<1x16x32xf32> to vector<1x16x32xf32>
    %4 = vector.broadcast %3 : vector<1x16x32xf32> to vector<4x16x32xf32>
    %c0_4 = arith.constant 0 : index
    %c0_5 = arith.constant 0 : index
    %c0_6 = arith.constant 0 : index
    %5 = vector.load %arg2[%c0_4, %c0_5, %c0_6] : memref<4x32x24xf32, #tpu.memory_space<vmem>>, vector<4x32x24xf32>
    "tpu.trace_start"() <{level = 10 : i32, message = "hnd,hde->hne"}> : () -> ()
    %cst = arith.constant dense<0.000000e+00> : vector<4x16x24xf32>
    %6 = tpu.matmul %4, %5, %cst {dimension_numbers = #tpu.dot_dimension_numbers<[2], [1], [1], [2], [0, 0, 0, 1, 1, 2], [0], [0]>} : vector<4x16x32xf32>, vector<4x32x24xf32>, vector<4x16x24xf32> -> vector<4x16x24xf32>
    "tpu.trace_stop"() : () -> ()
    %7 = vector.extract_strided_slice %6 {offsets = [0, 0, 0], sizes = [4, 16, 8], strides = [1, 1, 1]} : vector<4x16x24xf32> to vector<4x16x8xf32>
    %cst_7 = arith.constant 0.353553385 : f32
    %8 = vector.broadcast %cst_7 : f32 to vector<4x16x8xf32>
    %9 = arith.mulf %7, %8 : vector<4x16x8xf32>
    %10 = vector.shape_cast %9 : vector<4x16x8xf32> to vector<8x8x8xf32>
    %11 = vector.extract_strided_slice %6 {offsets = [0, 0, 8], sizes = [4, 16, 8], strides = [1, 1, 1]} : vector<4x16x24xf32> to vector<4x16x8xf32>
    %12 = vector.shape_cast %11 : vector<4x16x8xf32> to vector<8x8x8xf32>
    %13 = vector.extract_strided_slice %6 {offsets = [0, 0, 16], sizes = [4, 16, 8], strides = [1, 1, 1]} : vector<4x16x24xf32> to vector<4x16x8xf32>
    %14 = vector.shape_cast %13 : vector<4x16x8xf32> to vector<8x8x8xf32>
    "tpu.trace_start"() <{level = 10 : i32, message = "nqd,nkd->nqk"}> : () -> ()
    %cst_8 = arith.constant dense<0.000000e+00> : vector<8x8x8xf32>
    %15 = tpu.matmul %10, %12, %cst_8 {dimension_numbers = #tpu.dot_dimension_numbers<[2], [2], [1], [1], [0, 0, 0, 1, 1, 1], [0], [0]>} : vector<8x8x8xf32>, vector<8x8x8xf32>, vector<8x8x8xf32> -> vector<8x8x8xf32>
    "tpu.trace_stop"() : () -> ()
    %16 = arith.addf %15, %1 : vector<8x8x8xf32>
    %cst_9 = arith.constant dense<0xFF800000> : vector<8x8xf32>
    %17 = vector.multi_reduction <maximumf>, %16, %cst_9 [2] : vector<8x8x8xf32> to vector<8x8xf32>
    %18 = vector.shape_cast %17 : vector<8x8xf32> to vector<8x8x1xf32>
    %19 = vector.broadcast %18 : vector<8x8x1xf32> to vector<8x8x8xf32>
    %20 = arith.subf %16, %19 : vector<8x8x8xf32>
    %21 = math.exp %20 : vector<8x8x8xf32>
    %cst_10 = arith.constant dense<0.000000e+00> : vector<8x8xf32>
    %22 = vector.multi_reduction <add>, %21, %cst_10 [2] : vector<8x8x8xf32> to vector<8x8xf32>
    %23 = vector.shape_cast %22 : vector<8x8xf32> to vector<8x8x1xf32>
    %24 = tpu.reciprocal %23 {approx = true} : vector<8x8x1xf32> -> vector<8x8x1xf32>
    %25 = vector.broadcast %24 : vector<8x8x1xf32> to vector<8x8x8xf32>
    %26 = arith.mulf %21, %25 : vector<8x8x8xf32>
    %c0_11 = arith.constant 0 : index
    %c0_12 = arith.constant 0 : index
    %c0_13 = arith.constant 0 : index
    %27 = vector.load %arg7[%c0_11, %c0_12, %c0_13] : memref<8x8x8xf32, #tpu.memory_space<vmem>>, vector<8x8x8xf32>
    tpu.vector_store %arg7[%c0_11, %c0_12, %c0_13], %26 {strides = array<i32>} : memref<8x8x8xf32, #tpu.memory_space<vmem>>, vector<8x8x8xf32>,
    "tpu.trace_start"() <{level = 10 : i32, message = "nqk,nkd->nqd"}> : () -> ()
    %cst_14 = arith.constant dense<0.000000e+00> : vector<8x8x8xf32>
    %28 = tpu.matmul %26, %14, %cst_14 {dimension_numbers = #tpu.dot_dimension_numbers<[2], [1], [1], [2], [0, 0, 0, 1, 1, 2], [0], [0]>} : vector<8x8x8xf32>, vector<8x8x8xf32>, vector<8x8x8xf32> -> vector<8x8x8xf32>
    "tpu.trace_stop"() : () -> ()
    %29 = vector.shape_cast %28 : vector<8x8x8xf32> to vector<4x16x8xf32>
    %c0_15 = arith.constant 0 : index
    %c0_16 = arith.constant 0 : index
    %c0_17 = arith.constant 0 : index
    %30 = vector.load %arg3[%c0_15, %c0_16, %c0_17] : memref<4x8x32xf32, #tpu.memory_space<vmem>>, vector<4x8x32xf32>
    "tpu.trace_start"() <{level = 10 : i32, message = "hnd,hde->hne"}> : () -> ()
    %cst_18 = arith.constant dense<0.000000e+00> : vector<4x16x32xf32>
    %31 = tpu.matmul %29, %30, %cst_18 {dimension_numbers = #tpu.dot_dimension_numbers<[2], [1], [1], [2], [0, 0, 0, 1, 1, 2], [0], [0]>} : vector<4x16x8xf32>, vector<4x8x32xf32>, vector<4x16x32xf32> -> vector<4x16x32xf32>
    "tpu.trace_stop"() : () -> ()
    %cst_19 = arith.constant dense<0.000000e+00> : vector<16x32xf32>
    %32 = vector.multi_reduction <add>, %31, %cst_19 [0] : vector<4x16x32xf32> to vector<16x32xf32>
    %33 = arith.addf %32, %0 : vector<16x32xf32>
    %cst_20 = arith.constant dense<0.000000e+00> : vector<16xf32>
    %34 = vector.multi_reduction <add>, %33, %cst_20 [1] : vector<16x32xf32> to vector<16xf32>
    %35 = vector.shape_cast %34 : vector<16xf32> to vector<16x1xf32>
    %cst_21 = arith.constant 3.200000e+01 : f32
    %36 = vector.broadcast %cst_21 : f32 to vector<16x1xf32>
    %37 = arith.divf %35, %36 : vector<16x1xf32>
    %38 = vector.broadcast %37 : vector<16x1xf32> to vector<16x32xf32>
    %39 = arith.subf %33, %38 : vector<16x32xf32>
    %40 = arith.mulf %39, %39 : vector<16x32xf32>
    %cst_22 = arith.constant dense<0.000000e+00> : vector<16xf32>
    %41 = vector.multi_reduction <add>, %40, %cst_22 [1] : vector<16x32xf32> to vector<16xf32>
    %42 = vector.shape_cast %41 : vector<16xf32> to vector<16x1xf32>
    %cst_23 = arith.constant 3.200000e+01 : f32
    %43 = vector.broadcast %cst_23 : f32 to vector<16x1xf32>
    %44 = arith.divf %42, %43 : vector<16x1xf32>
    %45 = vector.broadcast %37 : vector<16x1xf32> to vector<16x32xf32>
    %46 = arith.subf %33, %45 : vector<16x32xf32>
    %cst_24 = arith.constant 9.99999974E-6 : f32
    %47 = vector.broadcast %cst_24 : f32 to vector<16x1xf32>
    %48 = arith.addf %44, %47 : vector<16x1xf32>
    %49 = math.rsqrt %48 : vector<16x1xf32>
    %50 = vector.broadcast %49 : vector<16x1xf32> to vector<16x32xf32>
    %51 = arith.mulf %46, %50 : vector<16x32xf32>
    %c0_25 = arith.constant 0 : index
    %c0_26 = arith.constant 0 : index
    %52 = vector.load %arg4[%c0_25, %c0_26] : memref<32x64xf32, #tpu.memory_space<vmem>>, vector<32x64xf32>
    %cst_27 = arith.constant dense<0.000000e+00> : vector<16x64xf32>
    %53 = tpu.matmul %51, %52, %cst_27 {dimension_numbers = #tpu.dot_dimension_numbers<[1], [0], [0], [1], [0, 0, 1, 1], [], []>} : vector<16x32xf32>, vector<32x64xf32>, vector<16x64xf32> -> vector<16x64xf32>
    %cst_28 = arith.constant 0.000000e+00 : f32
    %54 = vector.broadcast %cst_28 : f32 to vector<16x64xf32>
    %55 = arith.maximumf %53, %54 : vector<16x64xf32>
    %c0_29 = arith.constant 0 : index
    %c0_30 = arith.constant 0 : index
    %56 = vector.load %arg5[%c0_29, %c0_30] : memref<64x32xf32, #tpu.memory_space<vmem>>, vector<64x32xf32>
    %cst_31 = arith.constant dense<0.000000e+00> : vector<16x32xf32>
    %57 = tpu.matmul %55, %56, %cst_31 {dimension_numbers = #tpu.dot_dimension_numbers<[1], [0], [0], [1], [0, 0, 1, 1], [], []>} : vector<16x64xf32>, vector<64x32xf32>, vector<16x32xf32> -> vector<16x32xf32>
    %58 = arith.addf %57, %51 : vector<16x32xf32>
    %cst_32 = arith.constant dense<0.000000e+00> : vector<16xf32>
    %59 = vector.multi_reduction <add>, %58, %cst_32 [1] : vector<16x32xf32> to vector<16xf32>
    %60 = vector.shape_cast %59 : vector<16xf32> to vector<16x1xf32>
    %cst_33 = arith.constant 3.200000e+01 : f32
    %61 = vector.broadcast %cst_33 : f32 to vector<16x1xf32>
    %62 = arith.divf %60, %61 : vector<16x1xf32>
    %63 = vector.broadcast %62 : vector<16x1xf32> to vector<16x32xf32>
    %64 = arith.subf %58, %63 : vector<16x32xf32>
    %65 = arith.mulf %64, %64 : vector<16x32xf32>
    %cst_34 = arith.constant dense<0.000000e+00> : vector<16xf32>
    %66 = vector.multi_reduction <add>, %65, %cst_34 [1] : vector<16x32xf32> to vector<16xf32>
    %67 = vector.shape_cast %66 : vector<16xf32> to vector<16x1xf32>
    %cst_35 = arith.constant 3.200000e+01 : f32
    %68 = vector.broadcast %cst_35 : f32 to vector<16x1xf32>
    %69 = arith.divf %67, %68 : vector<16x1xf32>
    %70 = vector.broadcast %62 : vector<16x1xf32> to vector<16x32xf32>
    %71 = arith.subf %58, %70 : vector<16x32xf32>
    %cst_36 = arith.constant 9.99999974E-6 : f32
    %72 = vector.broadcast %cst_36 : f32 to vector<16x1xf32>
    %73 = arith.addf %69, %72 : vector<16x1xf32>
    %74 = math.rsqrt %73 : vector<16x1xf32>
    %75 = vector.broadcast %74 : vector<16x1xf32> to vector<16x32xf32>
    %76 = arith.mulf %71, %75 : vector<16x32xf32>
    %c0_37 = arith.constant 0 : index
    %c0_38 = arith.constant 0 : index
    %77 = vector.load %arg6[%c0_37, %c0_38] : memref<16x32xf32, #tpu.memory_space<vmem>>, vector<16x32xf32>
    tpu.vector_store %arg6[%c0_37, %c0_38], %76 {strides = array<i32>} : memref<16x32xf32, #tpu.memory_space<vmem>>, vector<16x32xf32>,
    return
  }
}

module attributes {stable_mosaic.version = 11 : i64} {
  func.func @encoder_layer_kernel(%arg0: memref<16x32xf32, #tpu.memory_space<vmem>>, %arg1: memref<8x8x8xf32, #tpu.memory_space<vmem>>, %arg2: memref<4x32x24xf32, #tpu.memory_space<vmem>>, %arg3: memref<4x8x32xf32, #tpu.memory_space<vmem>>, %arg4: memref<32x64xf32, #tpu.memory_space<vmem>>, %arg5: memref<64x32xf32, #tpu.memory_space<vmem>>, %arg6: memref<16x32xf32, #tpu.memory_space<vmem>>, %arg7: memref<8x8x8xf32, #tpu.memory_space<vmem>>) attributes {dimension_semantics = [], scalar_prefetch = 0 : i64, scratch_operands = 0 : i64, tpu.core_type = #tpu.core_type<tc>} {
    %c0 = arith.constant 0 : index
    %c0_0 = arith.constant 0 : index
    %0 = vector.load %arg0[%c0, %c0_0] : memref<16x32xf32, #tpu.memory_space<vmem>>, vector<16x32xf32>
    %c0_1 = arith.constant 0 : index
    %c0_2 = arith.constant 0 : index
    %c0_3 = arith.constant 0 : index
    %1 = vector.load %arg1[%c0_1, %c0_2, %c0_3] : memref<8x8x8xf32, #tpu.memory_space<vmem>>, vector<8x8x8xf32>
    %2 = vector.shape_cast %0 : vector<16x32xf32> to vector<1x16x32xf32>
    %3 = vector.shape_cast %2 : vector<1x16x32xf32> to vector<1x16x32xf32>
    %4 = vector.broadcast %3 : vector<1x16x32xf32> to vector<4x16x32xf32>
    %c0_4 = arith.constant 0 : index
    %c0_5 = arith.constant 0 : index
    %c0_6 = arith.constant 0 : index
    %5 = vector.load %arg2[%c0_4, %c0_5, %c0_6] : memref<4x32x24xf32, #tpu.memory_space<vmem>>, vector<4x32x24xf32>
    "tpu.trace_start"() <{level = 10 : i32, message = "hnd,hde->hne"}> : () -> ()
    %cst = arith.constant dense<0.000000e+00> : vector<4x16x24xf32>
    %6 = tpu.matmul %4, %5, %cst {dimension_numbers = #tpu.dot_dimension_numbers<[2], [1], [1], [2], [0, 0, 0, 1, 1, 2], [0], [0]>} : vector<4x16x32xf32>, vector<4x32x24xf32>, vector<4x16x24xf32> -> vector<4x16x24xf32>
    "tpu.trace_stop"() : () -> ()
    %7 = vector.extract_strided_slice %6 {offsets = [0, 0, 0], sizes = [4, 16, 8], strides = [1, 1, 1]} : vector<4x16x24xf32> to vector<4x16x8xf32>
    %cst_7 = arith.constant 0.353553385 : f32
    %8 = vector.broadcast %cst_7 : f32 to vector<4x16x8xf32>
    %9 = arith.mulf %7, %8 : vector<4x16x8xf32>
    %10 = vector.shape_cast %9 : vector<4x16x8xf32> to vector<8x8x8xf32>
    %11 = vector.extract_strided_slice %6 {offsets = [0, 0, 8], sizes = [4, 16, 8], strides = [1, 1, 1]} : vector<4x16x24xf32> to vector<4x16x8xf32>
    %12 = vector.shape_cast %11 : vector<4x16x8xf32> to vector<8x8x8xf32>
    %13 = vector.extract_strided_slice %6 {offsets = [0, 0, 16], sizes = [4, 16, 8], strides = [1, 1, 1]} : vector<4x16x24xf32> to vector<4x16x8xf32>
    %14 = vector.shape_cast %13 : vector<4x16x8xf32> to vector<8x8x8xf32>
    "tpu.trace_start"() <{level = 10 : i32, message = "nqd,nkd->nqk"}> : () -> ()
    %cst_8 = arith.constant dense<0.000000e+00> : vector<8x8x8xf32>
    %15 = tpu.matmul %10, %12, %cst_8 {dimension_numbers = #tpu.dot_dimension_numbers<[2], [2], [1], [1], [0, 0, 0, 1, 1, 1], [0], [0]>} : vector<8x8x8xf32>, vector<8x8x8xf32>, vector<8x8x8xf32> -> vector<8x8x8xf32>
    "tpu.trace_stop"() : () -> ()
    %16 = arith.addf %15, %1 : vector<8x8x8xf32>
    %cst_9 = arith.constant dense<0xFF800000> : vector<8x8xf32>
    %17 = vector.multi_reduction <maximumf>, %16, %cst_9 [2] : vector<8x8x8xf32> to vector<8x8xf32>
    %18 = vector.shape_cast %17 : vector<8x8xf32> to vector<8x8x1xf32>
    %19 = vector.broadcast %18 : vector<8x8x1xf32> to vector<8x8x8xf32>
    %20 = arith.subf %16, %19 : vector<8x8x8xf32>
    %21 = math.exp %20 : vector<8x8x8xf32>
    %cst_10 = arith.constant dense<0.000000e+00> : vector<8x8xf32>
    %22 = vector.multi_reduction <add>, %21, %cst_10 [2] : vector<8x8x8xf32> to vector<8x8xf32>
    %23 = vector.shape_cast %22 : vector<8x8xf32> to vector<8x8x1xf32>
    %24 = tpu.reciprocal %23 {approx = true} : vector<8x8x1xf32> -> vector<8x8x1xf32>
    %25 = vector.broadcast %24 : vector<8x8x1xf32> to vector<8x8x8xf32>
    %26 = arith.mulf %21, %25 : vector<8x8x8xf32>
    %c0_11 = arith.constant 0 : index
    %c0_12 = arith.constant 0 : index
    %c0_13 = arith.constant 0 : index
    %27 = vector.load %arg7[%c0_11, %c0_12, %c0_13] : memref<8x8x8xf32, #tpu.memory_space<vmem>>, vector<8x8x8xf32>
    tpu.vector_store %arg7[%c0_11, %c0_12, %c0_13], %26 {strides = array<i32>} : memref<8x8x8xf32, #tpu.memory_space<vmem>>, vector<8x8x8xf32>,
    "tpu.trace_start"() <{level = 10 : i32, message = "nqk,nkd->nqd"}> : () -> ()
    %cst_14 = arith.constant dense<0.000000e+00> : vector<8x8x8xf32>
    %28 = tpu.matmul %26, %14, %cst_14 {dimension_numbers = #tpu.dot_dimension_numbers<[2], [1], [1], [2], [0, 0, 0, 1, 1, 2], [0], [0]>} : vector<8x8x8xf32>, vector<8x8x8xf32>, vector<8x8x8xf32> -> vector<8x8x8xf32>
    "tpu.trace_stop"() : () -> ()
    %29 = vector.shape_cast %28 : vector<8x8x8xf32> to vector<4x16x8xf32>
    %c0_15 = arith.constant 0 : index
    %c0_16 = arith.constant 0 : index
    %c0_17 = arith.constant 0 : index
    %30 = vector.load %arg3[%c0_15, %c0_16, %c0_17] : memref<4x8x32xf32, #tpu.memory_space<vmem>>, vector<4x8x32xf32>
    "tpu.trace_start"() <{level = 10 : i32, message = "hnd,hde->hne"}> : () -> ()
    %cst_18 = arith.constant dense<0.000000e+00> : vector<4x16x32xf32>
    %31 = tpu.matmul %29, %30, %cst_18 {dimension_numbers = #tpu.dot_dimension_numbers<[2], [1], [1], [2], [0, 0, 0, 1, 1, 2], [0], [0]>} : vector<4x16x8xf32>, vector<4x8x32xf32>, vector<4x16x32xf32> -> vector<4x16x32xf32>
    "tpu.trace_stop"() : () -> ()
    %cst_19 = arith.constant dense<0.000000e+00> : vector<16x32xf32>
    %32 = vector.multi_reduction <add>, %31, %cst_19 [0] : vector<4x16x32xf32> to vector<16x32xf32>
    %33 = arith.addf %32, %0 : vector<16x32xf32>
    %cst_20 = arith.constant dense<0.000000e+00> : vector<16xf32>
    %34 = vector.multi_reduction <add>, %33, %cst_20 [1] : vector<16x32xf32> to vector<16xf32>
    %35 = vector.shape_cast %34 : vector<16xf32> to vector<16x1xf32>
    %cst_21 = arith.constant 3.200000e+01 : f32
    %36 = vector.broadcast %cst_21 : f32 to vector<16x1xf32>
    %37 = arith.divf %35, %36 : vector<16x1xf32>
    %38 = vector.broadcast %37 : vector<16x1xf32> to vector<16x32xf32>
    %39 = arith.subf %33, %38 : vector<16x32xf32>
    %40 = arith.mulf %39, %39 : vector<16x32xf32>
    %cst_22 = arith.constant dense<0.000000e+00> : vector<16xf32>
    %41 = vector.multi_reduction <add>, %40, %cst_22 [1] : vector<16x32xf32> to vector<16xf32>
    %42 = vector.shape_cast %41 : vector<16xf32> to vector<16x1xf32>
    %cst_23 = arith.constant 3.200000e+01 : f32
    %43 = vector.broadcast %cst_23 : f32 to vector<16x1xf32>
    %44 = arith.divf %42, %43 : vector<16x1xf32>
    %45 = vector.broadcast %37 : vector<16x1xf32> to vector<16x32xf32>
    %46 = arith.subf %33, %45 : vector<16x32xf32>
    %cst_24 = arith.constant 9.99999974E-6 : f32
    %47 = vector.broadcast %cst_24 : f32 to vector<16x1xf32>
    %48 = arith.addf %44, %47 : vector<16x1xf32>
    %49 = math.rsqrt %48 : vector<16x1xf32>
    %50 = vector.broadcast %49 : vector<16x1xf32> to vector<16x32xf32>
    %51 = arith.mulf %46, %50 : vector<16x32xf32>
    %c0_25 = arith.constant 0 : index
    %c0_26 = arith.constant 0 : index
    %52 = vector.load %arg4[%c0_25, %c0_26] : memref<32x64xf32, #tpu.memory_space<vmem>>, vector<32x64xf32>
    %cst_27 = arith.constant dense<0.000000e+00> : vector<16x64xf32>
    %53 = tpu.matmul %51, %52, %cst_27 {dimension_numbers = #tpu.dot_dimension_numbers<[1], [0], [0], [1], [0, 0, 1, 1], [], []>} : vector<16x32xf32>, vector<32x64xf32>, vector<16x64xf32> -> vector<16x64xf32>
    %cst_28 = arith.constant 0.000000e+00 : f32
    %54 = vector.broadcast %cst_28 : f32 to vector<16x64xf32>
    %55 = arith.maximumf %53, %54 : vector<16x64xf32>
    %c0_29 = arith.constant 0 : index
    %c0_30 = arith.constant 0 : index
    %56 = vector.load %arg5[%c0_29, %c0_30] : memref<64x32xf32, #tpu.memory_space<vmem>>, vector<64x32xf32>
    %cst_31 = arith.constant dense<0.000000e+00> : vector<16x32xf32>
    %57 = tpu.matmul %55, %56, %cst_31 {dimension_numbers = #tpu.dot_dimension_numbers<[1], [0], [0], [1], [0, 0, 1, 1], [], []>} : vector<16x64xf32>, vector<64x32xf32>, vector<16x32xf32> -> vector<16x32xf32>
    %58 = arith.addf %57, %51 : vector<16x32xf32>
    %cst_32 = arith.constant dense<0.000000e+00> : vector<16xf32>
    %59 = vector.multi_reduction <add>, %58, %cst_32 [1] : vector<16x32xf32> to vector<16xf32>
    %60 = vector.shape_cast %59 : vector<16xf32> to vector<16x1xf32>
    %cst_33 = arith.constant 3.200000e+01 : f32
    %61 = vector.broadcast %cst_33 : f32 to vector<16x1xf32>
    %62 = arith.divf %60, %61 : vector<16x1xf32>
    %63 = vector.broadcast %62 : vector<16x1xf32> to vector<16x32xf32>
    %64 = arith.subf %58, %63 : vector<16x32xf32>
    %65 = arith.mulf %64, %64 : vector<16x32xf32>
    %cst_34 = arith.constant dense<0.000000e+00> : vector<16xf32>
    %66 = vector.multi_reduction <add>, %65, %cst_34 [1] : vector<16x32xf32> to vector<16xf32>
    %67 = vector.shape_cast %66 : vector<16xf32> to vector<16x1xf32>
    %cst_35 = arith.constant 3.200000e+01 : f32
    %68 = vector.broadcast %cst_35 : f32 to vector<16x1xf32>
    %69 = arith.divf %67, %68 : vector<16x1xf32>
    %70 = vector.broadcast %62 : vector<16x1xf32> to vector<16x32xf32>
    %71 = arith.subf %58, %70 : vector<16x32xf32>
    %cst_36 = arith.constant 9.99999974E-6 : f32
    %72 = vector.broadcast %cst_36 : f32 to vector<16x1xf32>
    %73 = arith.addf %69, %72 : vector<16x1xf32>
    %74 = math.rsqrt %73 : vector<16x1xf32>
    %75 = vector.broadcast %74 : vector<16x1xf32> to vector<16x32xf32>
    %76 = arith.mulf %71, %75 : vector<16x32xf32>
    %c0_37 = arith.constant 0 : index
    %c0_38 = arith.constant 0 : index
    %77 = vector.load %arg6[%c0_37, %c0_38] : memref<16x32xf32, #tpu.memory_space<vmem>>, vector<16x32xf32>
    tpu.vector_store %arg6[%c0_37, %c0_38], %76 {strides = array<i32>} : memref<16x32xf32, #tpu.memory_space<vmem>>, vector<16x32xf32>,
    return
  }
}

</mosaic_0001>

<bundles_post_ra>
// kernel: encoder_forward.3
= control target key start
LH: loop header
LB: loop body
LE: loop exit
PB: predicated region body
PF: predicated region fallthrough
CT: control target
= control target key end

     0   :  { %vm52_vm0 = vcmask 261120   ;;  %s3132_s0 = inlined_call_operand.vmem [shape: f32[16,32], index: 0, kind: input, shape index: {}]   ;;  %s3133_s1 = inlined_call_operand.vmem [shape: f32[8,8,8], index: 1, kind: input, shape index: {}]   ;;  %s3134_s2 = inlined_call_operand.vmem [shape: f32[4,32,24], index: 2, kind: input, shape index: {}]   ;;  %s3135_s3 = inlined_call_operand.vmem [shape: f32[4,8,32], index: 3, kind: input, shape index: {}]   ;;  %s3136_s4 = inlined_call_operand.vmem [shape: f32[32,64], index: 4, kind: input, shape index: {}]   ;;  %s3137_s5 = inlined_call_operand.vmem [shape: f32[64,32], index: 5, kind: input, shape index: {}]   ;;  %s3138_s6 = inlined_call_operand.hbm [shape: f32[16,32], index: 6, kind: output, shape index: {0}]   ;;  %s3139_s7 = inlined_call_operand.vmem [shape: f32[8,8,8], index: 7, kind: output, shape index: {1}]  }
   0x1   :  { %v36_v0 = vld [vmem:[%s3134_s2] sm:$0xff]  ;;  %v37_v1 = vld [vmem:[%s3134_s2 + $0x8] sm:$0xff]  ;;  %v38_v5 = vld [vmem:[%s3134_s2 + $0x10] sm:$0xff] }
   0x2   :  { %v40_v2 = vld [vmem:[%s3134_s2 + $0x20] sm:$0xff]  ;;  %v2594_v3 = vpack.c.bf16 %v37_v1, %v36_v0  ;;  %v41_v4 = vld [vmem:[%s3134_s2 + $0x28] sm:$0xff]  ;;  %v39_v6 = vld [vmem:[%s3134_s2 + $0x18] sm:$0xff] }
   0x3   :  { %v2602_v7 = vpack.c.bf16 %v41_v4, %v40_v2  ;;  %v2598_v8 = vpack.c.bf16 %v39_v6, %v38_v5  ;;  %v42_v9 = vld [vmem:[%s3134_s2 + $0x30] sm:$0xff]  ;;  %v43_v10 = vld [vmem:[%s3134_s2 + $0x38] sm:$0xff]  ;;  %v2795_v11 = vld [vmem:[%s3132_s0] sm:$0xff] }
   0x4   :  { %2595 = vmatprep.subr.bf16.mxu0 %v2594_v3  ;;  %v2606_v12 = vpack.c.bf16 %v43_v10, %v42_v9  ;;  %2428 = vmatprep.mubr.msk.f32.mxu0 %vm52_vm0, %v2795_v11  ;;  %v44_v13 = vld [vmem:[%s3134_s2 + $0x40] sm:$0xff]  ;;  %v45_v14 = vld [vmem:[%s3134_s2 + $0x48] sm:$0xff]  ;;  %v46_v18 = vld [vmem:[%s3134_s2 + $0x50] sm:$0xff] }
   0x5   :  { %2603 = vmatprep.subr.bf16.mxu1 %v2602_v7  ;;  %2597 = vmatpush3.bf16.msra.mxu0 %v2594_v3  ;;  %v48_v15 = vld [vmem:[%s3134_s2 + $0x60] sm:$0xff]  ;;  %v2610_v16 = vpack.c.bf16 %v45_v14, %v44_v13  ;;  %v49_v17 = vld [vmem:[%s3134_s2 + $0x68] sm:$0xff]  ;;  %v47_v19 = vld [vmem:[%s3134_s2 + $0x58] sm:$0xff] }
   0x6   :  { %2605 = vmatpush3.bf16.msra.mxu1 %v2602_v7  ;;  %2599 = vmatprep.subr.bf16.mxu0 %v2598_v8  ;;  %v2618_v20 = vpack.c.bf16 %v49_v17, %v48_v15 }
   0x7   :  { %2607 = vmatprep.subr.bf16.mxu1 %v2606_v12  ;;  %2439 = vmatprep.mubr.msk.f32.mxu1 %vm52_vm0, %v2795_v11 }
   0x8   :  { %13 = vsyncpa [#allocation3], 0  ;;  %v50_v21 = vld [vmem:[%s3134_s2 + $0x70] sm:$0xff]  ;;  %v51_v22 = vld [vmem:[%s3134_s2 + $0x78] sm:$0xff]  ;;  %v2614_v24 = vpack.c.bf16 %v47_v19, %v46_v18  ;;  %v2721_v26 = vmov 0.0   ;;  %vm2722_vm1 = vmmov 0  }
   0x9   :  { %2601 = vmatpush3.bf16.msra.mxu0 %v2598_v8  ;;  %v2828_v23 = vld [vmem:[%s3132_s0 + $0x8] sm:$0xff]  ;;  %v2622_v25 = vpack.c.bf16 %v51_v22, %v50_v21  ;;  %s2723_s0 = smov 120   ;;  %vm370_vm2 = vcmask 64512   ;;  %v28_v51 = vld [vmem:[%s3133_s1] sm:$0xff]  ;;  %v30_v62 = vld [vmem:[%s3133_s1 + $0x10] sm:$0xff]  ;;  %s2724_s29 = smov 112  }
   0xa   :  { %2609 = vmatpush3.bf16.msra.mxu1 %v2606_v12  ;;  %2611 = vmatprep.subr.bf16.mxu0 %v2610_v16  ;;  %v29_v55 = vld [vmem:[%s3133_s1 + $0x8] sm:$0xff]  ;;  %v31_v0 = vld [vmem:[%s3133_s1 + $0x18] sm:$0xff]  ;;  %v32_v6 = vld [vmem:[%s3133_s1 + $0x20] sm:$0xff]  ;;  %vm2162_vm3 = vcmask 523264  }
   0xb   :  { %2619 = vmatprep.subr.bf16.mxu1 %v2618_v20  ;;  %v33_v9 = vld [vmem:[%s3133_s1 + $0x28] sm:$0xff] }
   0xc   :  { %2429 = vmatmul.mubr.msk.f32.vlgmr.msra.gmra.mrb[0].mxu0 %vm52_vm0, %v2828_v23 }
   0xd   :  { %2440 = vmatmul.mubr.msk.f32.vlgmr.msra.gmra.mrb[0].mxu1 %vm52_vm0, %v2828_v23  ;;  %2613 = vmatpush3.bf16.msra.mxu0 %v2610_v16  ;;  %v34_v16 = vld [vmem:[%s3133_s1 + $0x30] sm:$0xff] }
   0xe   :  { %2615 = vmatprep.subr.bf16.mxu0 %v2614_v24  ;;  %2621 = vmatpush3.bf16.msra.mxu1 %v2618_v20  ;;  %v35_v20 = vld [vmem:[%s3133_s1 + $0x38] sm:$0xff] }
   0xf   :  { %2450 = vmatprep.mubr.msk.f32.mxu0 %vm52_vm0, %v2795_v11  ;;  %2623 = vmatprep.subr.bf16.mxu1 %v2622_v25 }
  0x10   :  { %2461 = vmatprep.mubr.msk.f32.mxu1 %vm52_vm0, %v2795_v11 }
  0x11   :  { %2617 = vmatpush3.bf16.msra.mxu0 %v2614_v24 }
  0x12   :  { %2625 = vmatpush3.bf16.msra.mxu1 %v2622_v25  ;;  %2464 = vmatprep.subr.mxu0 %v2721_v26 }
  0x13   :  { %2479 = vmatprep.subr.mxu1 %v2721_v26 }
  0x14   :  { %2451 = vmatmul.mubr.msk.f32.vlgmr.msra.gmra.mrb[2].mxu0 %vm52_vm0, %v2828_v23 }
  0x15   :  { %2462 = vmatmul.mubr.msk.f32.vlgmr.msra.gmra.mrb[2].mxu1 %vm52_vm0, %v2828_v23  ;;  %2466 = vmatprep.mubr.msk.f32.mxu0 %vm2722_vm1, %v2721_v26 }
  0x16   :  { %2481 = vmatprep.mubr.msk.f32.mxu1 %vm2722_vm1, %v2721_v26 }
  0xdf   :  { %v2848_v27 = vpop.f32.mrb[0].mxu0 }
  0xe0   :  { %v2850_v28 = vpop.f32.mrb[0].mxu1  ;;  %v2852_v29 = vpop.f32.mrb[1].mxu0  ;;  %v360_v40 = vmul.f32 0.35355338, %v2848_v27 }
  0xe1   :  { %v2854_v30 = vpop.f32.mrb[1].mxu1  ;;  %368 = vrot.lane.b32.xlu0 %v2852_v29, %s2723_s0  ;;  %v359_v37 = vmul.f32 0.35355338, %v2852_v29  ;;  %v362_v41 = vmul.f32 0.35355338, %v2850_v28 }
  0xe2   :  { %525 = vrot.lane.b32.xlu1 %v2854_v30, %s2723_s0  ;;  %v361_v44 = vmul.f32 0.35355338, %v2854_v30 }
  0xe5   :  { %447 = vrot.lane.b32.xlu0 %v2848_v27, %s2723_s0 }
  0xe6   :  { %603 = vrot.lane.b32.xlu1 %v2850_v28, %s2723_s0 }
  0xe7   :  { %v2860_v31 = vpop.f32.mrb[2].mxu0 }
  0xe8   :  { %v2862_v32 = vpop.f32.mrb[3].mxu0  ;;  %v2864_v33 = vpop.f32.mrb[2].mxu1  ;;  %v364_v45 = vmul.f32 0.35355338, %v2860_v31 }
  0xe9   :  { %681 = vrot.lane.b32.xlu0 %v2862_v32, %s2723_s0  ;;  %v2867_v34 = vpop.f32.mrb[3].mxu1  ;;  %v363_v47 = vmul.f32 0.35355338, %v2862_v32  ;;  %v366_v49 = vmul.f32 0.35355338, %v2864_v33 }
  0xea   :  { %759 = vrot.lane.b32.xlu1 %v2860_v31, %s2723_s0  ;;  %v365_v50 = vmul.f32 0.35355338, %v2867_v34 }
  0xed   :  { %837 = vrot.lane.b32.xlu0 %v2867_v34, %s2723_s0 }
  0xee   :  { %915 = vrot.lane.b32.xlu1 %v2864_v33, %s2723_s0 }
 0x153   :  { %v369_v35 = vpop.permute.xlu0 %368 }
 0x154   :  { %v526_v36 = vpop.permute.xlu1 %525  ;;  %2465 = vmatpush3.xpose.msk.msra.mxu0 %vm370_vm2, %v369_v35 }
 0x155   :  { %2469 = vmatprep.subr.mxu0 %v2721_v26 }
 0x157   :  { %v448_v38 = vpop.permute.xlu0 %447  ;;  %2467 = vmatmul.mubr.msk.f32.vlgmr.msra.gmra.mrb[4].mxu0 %vm370_vm2, %v359_v37 }
 0x158   :  { %v604_v39 = vpop.permute.xlu1 %603  ;;  %2470 = vmatpush3.xpose.msk.msra.mxu0 %vm370_vm2, %v448_v38  ;;  %2471 = vmatprep.mubr.msk.f32.mxu0 %vm2722_vm1, %v2721_v26 }
 0x159   :  { %2480 = vmatpush3.xpose.msk.msra.mxu1 %vm370_vm2, %v604_v39  ;;  %2474 = vmatprep.subr.mxu0 %v2721_v26 }
 0x15a   :  { %2489 = vmatprep.subr.mxu1 %v2721_v26 }
 0x15b   :  { %2472 = vmatmul.mubr.msk.f32.vlgmr.msra.gmra.mrb[6].mxu0 %vm370_vm2, %v360_v40  ;;  %v682_v42 = vpop.permute.xlu0 %681 }
 0x15c   :  { %2482 = vmatmul.mubr.msk.f32.vlgmr.msra.gmra.mrb[4].mxu1 %vm370_vm2, %v362_v41  ;;  %v760_v43 = vpop.permute.xlu1 %759  ;;  %2475 = vmatpush3.xpose.msk.msra.mxu0 %vm370_vm2, %v526_v36 }
 0x15d   :  { %2490 = vmatpush3.xpose.msk.msra.mxu1 %vm370_vm2, %v760_v43  ;;  %2476 = vmatprep.mubr.msk.f32.mxu0 %vm2722_vm1, %v2721_v26 }
 0x15e   :  { %2491 = vmatprep.mubr.msk.f32.mxu1 %vm2722_vm1, %v2721_v26  ;;  %2484 = vmatprep.subr.mxu0 %v2721_v26 }
 0x15f   :  { %2477 = vmatmul.mubr.msk.f32.vlgmr.msra.gmra.mrb[8].mxu0 %vm370_vm2, %v361_v44  ;;  %2499 = vmatprep.subr.mxu1 %v2721_v26  ;;  %v838_v48 = vpop.permute.xlu0 %837 }
 0x160   :  { %v916_v46 = vpop.permute.xlu1 %915  ;;  %2492 = vmatmul.mubr.msk.f32.vlgmr.msra.gmra.mrb[6].mxu1 %vm370_vm2, %v364_v45  ;;  %2485 = vmatpush3.xpose.msk.msra.mxu0 %vm370_vm2, %v682_v42 }
 0x161   :  { %2500 = vmatpush3.xpose.msk.msra.mxu1 %vm370_vm2, %v916_v46  ;;  %2486 = vmatprep.mubr.msk.f32.mxu0 %vm2722_vm1, %v2721_v26 }
 0x162   :  { %2501 = vmatprep.mubr.msk.f32.mxu1 %vm2722_vm1, %v2721_v26  ;;  %2494 = vmatprep.subr.mxu0 %v2721_v26 }
 0x163   :  { %2487 = vmatmul.mubr.msk.f32.vlgmr.msra.gmra.mrb[10].mxu0 %vm370_vm2, %v363_v47  ;;  %2509 = vmatprep.subr.mxu1 %v2721_v26 }
 0x164   :  { %2502 = vmatmul.mubr.msk.f32.vlgmr.msra.gmra.mrb[8].mxu1 %vm370_vm2, %v366_v49  ;;  %2495 = vmatpush3.xpose.msk.msra.mxu0 %vm370_vm2, %v838_v48 }
 0x165   :  { %2496 = vmatprep.mubr.msk.f32.mxu0 %vm2722_vm1, %v2721_v26  ;;  %2504 = vmatprep.subr.mxu0 %v2721_v26 }
 0x166   :  { %2511 = vmatprep.mubr.msk.f32.mxu1 %vm2722_vm1, %v2721_v26 }
 0x167   :  { %2497 = vmatmul.mubr.msk.f32.vlgmr.msra.gmra.mrb[12].mxu0 %vm370_vm2, %v365_v50 }
 0x168   :  { %2506 = vmatprep.mubr.msk.f32.mxu0 %vm2722_vm1, %v2721_v26 }
 0x22a   :  { %v442_v52 = vpop.f32.mrb[4].mxu0 }
 0x22b   :  { %v443_v53 = vadd.f32 %v442_v52, %v28_v51  ;;  %v2468_v54 = vpop.f32.mrb[5].mxu0 }
 0x22d   :  { %v992_v56 = vsel %vm370_vm2, %v443_v53, -inf }
 0x22e   :  { %993 = vmax.xlane.f32.xlu0 %v992_v56  ;;  %v520_v57 = vpop.f32.mrb[6].mxu0 }
 0x22f   :  { %v676_v58 = vpop.f32.mrb[4].mxu1  ;;  %v521_v59 = vadd.f32 %v520_v57, %v29_v55  ;;  %v2473_v60 = vpop.f32.mrb[7].mxu0 }
 0x230   :  { %v2483_v61 = vpop.f32.mrb[5].mxu1  ;;  %v677_v7 = vadd.f32 %v676_v58, %v31_v0 }
 0x231   :  { %v995_v63 = vsel %vm370_vm2, %v521_v59, -inf }
 0x232   :  { %996 = vmax.xlane.f32.xlu1 %v995_v63  ;;  %v598_v1 = vpop.f32.mrb[8].mxu0  ;;  %v1001_v18 = vsel %vm370_vm2, %v677_v7, -inf }
 0x233   :  { %v832_v2 = vpop.f32.mrb[6].mxu1  ;;  %v599_v3 = vadd.f32 %v598_v1, %v30_v62  ;;  %v2478_v4 = vpop.f32.mrb[9].mxu0 }
 0x234   :  { %v2493_v5 = vpop.f32.mrb[7].mxu1  ;;  %v833_v17 = vadd.f32 %v832_v2, %v33_v9 }
 0x235   :  { %v998_v8 = vsel %vm370_vm2, %v599_v3, -inf }
 0x236   :  { %999 = vmax.xlane.f32.xlu0 %v998_v8  ;;  %v754_v10 = vpop.f32.mrb[10].mxu0  ;;  %v1007_v35 = vsel %vm370_vm2, %v833_v17, -inf }
 0x237   :  { %v988_v12 = vpop.f32.mrb[8].mxu1  ;;  %v755_v13 = vadd.f32 %v754_v10, %v32_v6  ;;  %v2488_v14 = vpop.f32.mrb[11].mxu0 }
 0x238   :  { %v2503_v15 = vpop.f32.mrb[9].mxu1  ;;  %v989_v25 = vadd.f32 %v988_v12, %v35_v20 }
 0x239   :  { %v1004_v19 = vsel %vm370_vm2, %v755_v13, -inf }
 0x23a   :  { %1002 = vmax.xlane.f32.xlu0 %v1001_v18  ;;  %1005 = vmax.xlane.f32.xlu1 %v1004_v19  ;;  %v910_v21 = vpop.f32.mrb[12].mxu0  ;;  %v1013_v37 = vsel %vm370_vm2, %v989_v25, -inf }
 0x23b   :  { %v911_v22 = vadd.f32 %v910_v21, %v34_v16  ;;  %v2498_v24 = vpop.f32.mrb[13].mxu0 }
 0x23d   :  { %v1010_v36 = vsel %vm370_vm2, %v911_v22, -inf }
 0x23e   :  { %1008 = vmax.xlane.f32.xlu0 %v1007_v35  ;;  %1011 = vmax.xlane.f32.xlu1 %v1010_v36 }
 0x242   :  { %1014 = vmax.xlane.f32.xlu0 %v1013_v37 }
 0x24f   :  { %1088 = vrot.lane.b32.xlu1 %v2852_v29, %s2724_s29 }
 0x253   :  { %1240 = vrot.lane.b32.xlu1 %v2854_v30, %s2724_s29 }
 0x257   :  { %1316 = vrot.lane.b32.xlu1 %v2850_v28, %s2724_s29 }
 0x258   :  { %1164 = vrot.lane.b32.xlu0 %v2848_v27, %s2724_s29 }
 0x25b   :  { %1468 = vrot.lane.b32.xlu1 %v2860_v31, %s2724_s29 }
 0x25c   :  { %1392 = vrot.lane.b32.xlu0 %v2862_v32, %s2724_s29 }
 0x2bb   :  { %v994_v38 = vpop.xlane.xlu0 %993 }
 0x2bc   :  { %v1016_v39 = vsub.f32 %v443_v53, %v994_v38 }
 0x2be   :  { %v1024_v40 = vmul.f32 1.442695, %v1016_v39 }
 0x2bf   :  { %v997_v29 = vpop.xlane.xlu1 %996 }
 0x2c0   :  { %2657 = vpow2.f32 %v1024_v40  ;;  %v1017_v30 = vsub.f32 %v521_v59, %v997_v29 }
 0x2c2   :  { %v1026_v47 = vmul.f32 1.442695, %v1017_v30 }
 0x2c3   :  { %v1000_v41 = vpop.xlane.xlu0 %999 }
 0x2c4   :  { %v1018_v42 = vsub.f32 %v599_v3, %v1000_v41 }
 0x2c6   :  { %v1028_v43 = vmul.f32 1.442695, %v1018_v42 }
 0x2c7   :  { %v1003_v44 = vpop.xlane.xlu0 %1002  ;;  %v1006_v28 = vpop.xlane.xlu1 %1005 }
 0x2c8   :  { %2659 = vpow2.f32 %v1028_v43  ;;  %v1019_v45 = vsub.f32 %v677_v7, %v1003_v44  ;;  %v1020_v27 = vsub.f32 %v755_v13, %v1006_v28 }
 0x2ca   :  { %v2658_v46 = vpop.eup %2657  ;;  %v1030_v31 = vmul.f32 1.442695, %v1019_v45  ;;  %v1032_v48 = vmul.f32 1.442695, %v1020_v27  ;;  %v1696_v27 = vld [vmem:[%s3135_s3] sm:$0xff] }
 0x2cb   :  { %v1009_v49 = vpop.xlane.xlu0 %1008  ;;  %v1012_v32 = vpop.xlane.xlu1 %1011  ;;  %v1040_v50 = vsel %vm370_vm2, %v2658_v46, 0.0 }
 0x2cc   :  { %2661 = vpow2.f32 %v1030_v31  ;;  %v1021_v51 = vsub.f32 %v833_v17, %v1009_v49  ;;  %v1022_v52 = vsub.f32 %v911_v22, %v1012_v32  ;;  %1041 = vadd.xlane.f32.xlu1 %v1040_v50 }
 0x2cd   :  { %2663 = vpow2.f32 %v1032_v48 }
 0x2ce   :  { %2665 = vpow2.f32 %v1026_v47  ;;  %v1034_v53 = vmul.f32 1.442695, %v1021_v51  ;;  %v1036_v54 = vmul.f32 1.442695, %v1022_v52  ;;  %v1698_v47 = vld [vmem:[%s3135_s3 + $0x10] sm:$0xff] }
 0x2cf   :  { %v1015_v55 = vpop.xlane.xlu0 %1014  ;;  %v1089_v56 = vpop.permute.xlu1 %1088 }
 0x2d0   :  { %v1023_v57 = vsub.f32 %v989_v25, %v1015_v55  ;;  %2505 = vmatpush3.msra.mxu0 %v1089_v56  ;;  %2667 = vpow2.f32 %v1036_v54 }
 0x2d1   :  { %2514 = vmatprep.subr.mxu0 %v2721_v26  ;;  %2669 = vpow2.f32 %v1034_v53 }
 0x2d2   :  { %v2660_v58 = vpop.eup %2659  ;;  %v1038_v59 = vmul.f32 1.442695, %v1023_v57 }
 0x2d3   :  { %v1165_v60 = vpop.permute.xlu0 %1164  ;;  %v1046_v61 = vsel %vm370_vm2, %v2660_v58, 0.0  ;;  %v1241_v10 = vpop.permute.xlu1 %1240 }
 0x2d4   :  { %2510 = vmatpush3.msra.mxu1 %v1165_v60  ;;  %1047 = vadd.xlane.f32.xlu1 %v1046_v61  ;;  %2671 = vpow2.f32 %v1038_v59 }
 0x2d5   :  { %2519 = vmatprep.subr.mxu1 %v2721_v26 }
 0x2d6   :  { %v2662_v62 = vpop.eup %2661 }
 0x2d7   :  { %v2664_v63 = vpop.eup %2663  ;;  %v1049_v0 = vsel %vm370_vm2, %v2662_v62, 0.0  ;;  %v1317_v12 = vpop.permute.xlu1 %1316 }
 0x2d8   :  { %v2666_v1 = vpop.eup %2665  ;;  %1050 = vadd.xlane.f32.xlu0 %v1049_v0  ;;  %v1052_v2 = vsel %vm370_vm2, %v2664_v63, 0.0  ;;  %v1393_v15 = vpop.permute.xlu0 %1392 }
 0x2d9   :  { %1053 = vadd.xlane.f32.xlu1 %v1052_v2  ;;  %v1043_v4 = vsel %vm370_vm2, %v2666_v1, 0.0 }
 0x2da   :  { %v2668_v3 = vpop.eup %2667 }
 0x2db   :  { %v2971_v5 = vpop.eup %2669  ;;  %v1058_v6 = vsel %vm370_vm2, %v2668_v3, 0.0  ;;  %v1469_v13 = vpop.permute.xlu1 %1468 }
 0x2dc   :  { %1044 = vadd.xlane.f32.xlu0 %v1043_v4  ;;  %v1055_v7 = vsel %vm370_vm2, %v2971_v5, 0.0 }
 0x2dd   :  { %1059 = vadd.xlane.f32.xlu1 %v1058_v6 }
 0x2de   :  { %v2976_v8 = vpop.eup %2671 }
 0x2df   :  { %v1061_v9 = vsel %vm370_vm2, %v2976_v8, 0.0 }
 0x2e0   :  { %1056 = vadd.xlane.f32.xlu0 %v1055_v7 }
 0x2e4   :  { %1062 = vadd.xlane.f32.xlu0 %v1061_v9 }
 0x2ee   :  { %1620 = vrot.lane.b32.xlu1 %v2864_v33, %s2724_s29 }
 0x2fa   :  { %1544 = vrot.lane.b32.xlu0 %v2867_v34, %s2724_s29 }
 0x359   :  { %v1042_v14 = vpop.xlane.xlu1 %1041 }
 0x35a   :  { %2673 = vrcp.f32 %v1042_v14 }
 0x361   :  { %v1048_v16 = vpop.xlane.xlu1 %1047 }
 0x362   :  { %2675 = vrcp.f32 %v1048_v16 }
 0x364   :  { %v2674_v17 = vpop.eup %2673 }
 0x365   :  { %v1072_v18 = vmul.f32 %v2674_v17, %v2658_v46  ;;  %v1051_v19 = vpop.xlane.xlu0 %1050  ;;  %v1697_v46 = vld [vmem:[%s3135_s3 + $0x8] sm:$0xff] }
 0x366   :  { %2677 = vrcp.f32 %v1051_v19  ;;  %v1054_v20 = vpop.xlane.xlu1 %1053 }
 0x367   :  { %1080 = vst.msk [vmem:[%s3139_s7] sm:$0xff] %vm370_vm2, %v1072_v18  ;;  %2679 = vrcp.f32 %v1054_v20  ;;  %2507 = vmatmul.mubr.msk.f32.vlgmr.msra.gmra.mrb[14].mxu0 %vm370_vm2, %v1072_v18 }
 0x368   :  { %2515 = vmatpush3.msra.mxu0 %v1241_v10  ;;  %2516 = vmatprep.mubr.msk.f32.mxu0 %vm2722_vm1, %v2721_v26 }
 0x369   :  { %v1045_v33 = vpop.xlane.xlu0 %1044  ;;  %2524 = vmatprep.subr.mxu0 %v2721_v26 }
 0x36a   :  { %2681 = vrcp.f32 %v1045_v33  ;;  %v1060_v34 = vpop.xlane.xlu1 %1059 }
 0x36b   :  { %2683 = vrcp.f32 %v1060_v34 }
 0x36c   :  { %v2676_v21 = vpop.eup %2675 }
 0x36d   :  { %v1074_v22 = vmul.f32 %v2676_v21, %v2660_v58  ;;  %v1057_v24 = vpop.xlane.xlu0 %1056 }
 0x36e   :  { %2685 = vrcp.f32 %v1057_v24  ;;  %v1621_v45 = vpop.permute.xlu1 %1620 }
 0x36f   :  { %1082 = vst.msk [vmem:[%s3139_s7 + $0x10] sm:$0xff] %vm370_vm2, %v1074_v22  ;;  %2517 = vmatmul.mubr.msk.f32.vlgmr.msra.gmra.mrb[16].mxu0 %vm370_vm2, %v1074_v22 }
 0x370   :  { %v2678_v25 = vpop.eup %2677  ;;  %2525 = vmatpush3.msra.mxu0 %v1393_v15  ;;  %2526 = vmatprep.mubr.msk.f32.mxu0 %vm2722_vm1, %v2721_v26 }
 0x371   :  { %v2680_v35 = vpop.eup %2679  ;;  %v1075_v36 = vmul.f32 %v2678_v25, %v2662_v62  ;;  %v1063_v37 = vpop.xlane.xlu0 %1062  ;;  %2534 = vmatprep.subr.mxu0 %v2721_v26 }
 0x372   :  { %v1076_v38 = vmul.f32 %v2680_v35, %v2664_v63  ;;  %2687 = vrcp.f32 %v1063_v37 }
 0x373   :  { %1083 = vst.msk [vmem:[%s3139_s7 + $0x18] sm:$0xff] %vm370_vm2, %v1075_v36 }
 0x374   :  { %v2682_v39 = vpop.eup %2681  ;;  %1084 = vst.msk [vmem:[%s3139_s7 + $0x20] sm:$0xff] %vm370_vm2, %v1076_v38  ;;  %2527 = vmatmul.mubr.msk.f32.vlgmr.msra.gmra.mrb[18].mxu0 %vm370_vm2, %v1076_v38 }
 0x375   :  { %v2684_v40 = vpop.eup %2683  ;;  %v1073_v29 = vmul.f32 %v2682_v39, %v2666_v1  ;;  %v1545_v41 = vpop.permute.xlu0 %1544  ;;  %2536 = vmatprep.mubr.msk.f32.mxu0 %vm2722_vm1, %v2721_v26 }
 0x376   :  { %v1078_v42 = vmul.f32 %v2684_v40, %v2668_v3  ;;  %2535 = vmatpush3.msra.mxu0 %v1545_v41  ;;  %v2068_v41 = vld [vmem:[%s3136_s4 + $0x8] sm:$0xff] }
 0x377   :  { %1081 = vst.msk [vmem:[%s3139_s7 + $0x8] sm:$0xff] %vm370_vm2, %v1073_v29  ;;  %2512 = vmatmul.mubr.msk.f32.vlgmr.msra.gmra.mrb[10].mxu1 %vm370_vm2, %v1073_v29  ;;  %2544 = vmatprep.subr.mxu0 %v1696_v27 }
 0x378   :  { %v2686_v30 = vpop.eup %2685  ;;  %1086 = vst.msk [vmem:[%s3139_s7 + $0x30] sm:$0xff] %vm370_vm2, %v1078_v42  ;;  %2520 = vmatpush3.msra.mxu1 %v1317_v12  ;;  %2537 = vmatmul.mubr.msk.f32.vlgmr.msra.gmra.mrb[20].mxu0 %vm370_vm2, %v1078_v42  ;;  %v2069_v42 = vld [vmem:[%s3136_s4 + $0x10] sm:$0xff] }
 0x379   :  { %v1077_v43 = vmul.f32 %v2686_v30, %v2971_v5  ;;  %2521 = vmatprep.mubr.msk.f32.mxu1 %vm2722_vm1, %v2721_v26  ;;  %2529 = vmatprep.subr.mxu1 %v2721_v26 }
 0x37a   :  { %2545 = vmatpush3.msra.mxu0 %v1696_v27  ;;  %v2156_v27 = vld [vmem:[%s3137_s5 + $0x10] sm:$0xff] }
 0x37b   :  { %1085 = vst.msk [vmem:[%s3139_s7 + $0x28] sm:$0xff] %vm370_vm2, %v1077_v43  ;;  %2522 = vmatmul.mubr.msk.f32.vlgmr.msra.gmra.mrb[12].mxu1 %vm370_vm2, %v1075_v36  ;;  %2554 = vmatprep.subr.mxu0 %v1698_v47 }
 0x37c   :  { %v2688_v44 = vpop.eup %2687  ;;  %2530 = vmatpush3.msra.mxu1 %v1469_v13  ;;  %2531 = vmatprep.mubr.msk.f32.mxu1 %vm2722_vm1, %v2721_v26 }
 0x37d   :  { %v1079_v28 = vmul.f32 %v2688_v44, %v2976_v8  ;;  %2539 = vmatprep.subr.mxu1 %v2721_v26 }
 0x37f   :  { %1087 = vst.msk [vmem:[%s3139_s7 + $0x38] sm:$0xff] %vm370_vm2, %v1079_v28  ;;  %2532 = vmatmul.mubr.msk.f32.vlgmr.msra.gmra.mrb[14].mxu1 %vm370_vm2, %v1077_v43  ;;  %v2070_v43 = vld [vmem:[%s3136_s4 + $0x18] sm:$0xff] }
 0x380   :  { %2540 = vmatpush3.msra.mxu1 %v1621_v45  ;;  %2541 = vmatprep.mubr.msk.f32.mxu1 %vm2722_vm1, %v2721_v26  ;;  %v1699_v26 = vld [vmem:[%s3135_s3 + $0x18] sm:$0xff]  ;;  %v2630_v44 = vpack.c.bf16 %v2070_v43, %v2069_v42  ;;  %v2155_v45 = vld [vmem:[%s3137_s5 + $0x8] sm:$0xff] }
 0x381   :  { %2549 = vmatprep.subr.mxu1 %v1697_v46 }
 0x383   :  { %2542 = vmatmul.mubr.msk.f32.vlgmr.msra.gmra.mrb[16].mxu1 %vm370_vm2, %v1079_v28  ;;  %v2154_v28 = vld [vmem:[%s3137_s5] sm:$0xff] }
 0x384   :  { %2550 = vmatpush3.msra.mxu1 %v1697_v46  ;;  %v2634_v46 = vpack.c.bf16 %v2155_v45, %v2154_v28 }
 0x385   :  { %2559 = vmatprep.subr.mxu1 %v1699_v26 }
 0x43a   :  { %v1160_v31 = vpop.f32.mrb[14].mxu0 }
 0x43b   :  { %v2508_v48 = vpop.f32.mrb[15].mxu0  ;;  %2546 = vmatprep.mubr.msk.f32.mxu0 %vm370_vm2, %v1160_v31  ;;  %v2158_v31 = vld [vmem:[%s3137_s5 + $0x20] sm:$0xff] }
 0x43c   :  { %v2159_v48 = vld [vmem:[%s3137_s5 + $0x28] sm:$0xff] }
 0x442   :  { %v1312_v49 = vpop.f32.mrb[16].mxu0 }
 0x443   :  { %v2518_v32 = vpop.f32.mrb[17].mxu0  ;;  %2551 = vmatprep.mubr.msk.f32.mxu1 %vm370_vm2, %v1312_v49  ;;  %v2642_v49 = vpack.c.bf16 %v2159_v48, %v2158_v31 }
 0x447   :  { %v1464_v50 = vpop.f32.mrb[18].mxu0 }
 0x448   :  { %v2528_v51 = vpop.f32.mrb[19].mxu0 }
 0x44a   :  { %v1236_v52 = vpop.f32.mrb[10].mxu1 }
 0x44b   :  { %v1616_v53 = vpop.f32.mrb[20].mxu0  ;;  %v2513_v54 = vpop.f32.mrb[11].mxu1  ;;  %2547 = vmatmul.mubr.msk.f32.vlgmr.msra.gmra.mrb[22].mxu0 %vm370_vm2, %v1236_v52 }
 0x44c   :  { %v2538_v55 = vpop.f32.mrb[21].mxu0  ;;  %2556 = vmatprep.mubr.msk.f32.mxu0 %vm370_vm2, %v1464_v50  ;;  %2555 = vmatpush3.msra.mxu0 %v1698_v47  ;;  %v2157_v47 = vld [vmem:[%s3137_s5 + $0x18] sm:$0xff] }
 0x44e   :  { %v1388_v56 = vpop.f32.mrb[12].mxu1 }
 0x44f   :  { %v2523_v57 = vpop.f32.mrb[13].mxu1  ;;  %2552 = vmatmul.mubr.msk.f32.vlgmr.msra.gmra.mrb[18].mxu1 %vm370_vm2, %v1388_v56 }
 0x450   :  { %2561 = vmatprep.mubr.msk.f32.mxu1 %vm370_vm2, %v1616_v53  ;;  %2560 = vmatpush3.msra.mxu1 %v1699_v26  ;;  %v2638_v26 = vpack.c.bf16 %v2157_v47, %v2156_v27 }
 0x451   :  { %2635 = vmatprep.subr.bf16.mxu1 %v2634_v46 }
 0x452   :  { %v1540_v58 = vpop.f32.mrb[14].mxu1 }
 0x453   :  { %v2533_v59 = vpop.f32.mrb[15].mxu1  ;;  %2557 = vmatmul.mubr.msk.f32.vlgmr.msra.gmra.mrb[24].mxu0 %vm370_vm2, %v1540_v58 }
 0x454   :  { %v2160_v59 = vld [vmem:[%s3137_s5 + $0x30] sm:$0xff] }
 0x456   :  { %v1692_v60 = vpop.f32.mrb[16].mxu1 }
 0x457   :  { %v2543_v61 = vpop.f32.mrb[17].mxu1  ;;  %2562 = vmatmul.mubr.msk.f32.vlgmr.msra.gmra.mrb[20].mxu1 %vm370_vm2, %v1692_v60  ;;  %v2161_v60 = vld [vmem:[%s3137_s5 + $0x38] sm:$0xff]  ;;  %s2725_s5 = smov [#allocation2]  }
 0x458   :  { %2637 = vmatpush3.bf16.msra.mxu1 %v2634_v46  ;;  %v2646_v61 = vpack.c.bf16 %v2161_v60, %v2160_v59  ;;  %s2277_s23 = sshll.u32 %s2725_s5, 4  ;;  %s2278_s23 = int_to_ptr.vmem [resolvable:$true] %s2277_s23 }
 0x459   :  { %2639 = vmatprep.subr.bf16.mxu1 %v2638_v26  ;;  %s2697_s7 = scalar_lea.vmem %s2278_s23, 256  ;;  %p2702_p1 = scmp.lt.s32.totalorder %s2278_s23, %s2278_s23 }
 0x45a   :  { %p2698_p0 = scmp.ne.s32.totalorder %s2278_s23, %s2697_s7  ;;  %p2703_p2 = scmp.lt.s32.totalorder %s2697_s7, %s2697_s7 }
 0x45c   :  { %2641 = vmatpush3.bf16.msra.mxu1 %v2638_v26  ;;  %p2704_p3 = por %p2703_p2, %p2702_p1 }
 0x45d   :  { %2643 = vmatprep.subr.bf16.mxu1 %v2642_v49 }
 0x45e   :  { %p2705_p4 = pnand %p2704_p3, %p2698_p0 }
 0x460   :  { %2645 = vmatpush3.bf16.msra.mxu1 %v2642_v49 }
 0x461   :  { %2647 = vmatprep.subr.bf16.mxu1 %v2646_v61 }
 0x464   :  { %2649 = vmatpush3.bf16.msra.mxu1 %v2646_v61 }
 0x51e   :  { %v2548_v62 = vpop.f32.mrb[22].mxu0 }
 0x51f   :  { %v1772_v63 = vpop.f32.mrb[23].mxu0  ;;  %v2031_v1 = vsel %vm52_vm0, %v2548_v62, 0.0 }
 0x520   :  { %v2024_v4 = vsel %vm52_vm0, %v1772_v63, 0.0 }
 0x522   :  { %v2553_v0 = vpop.f32.mrb[18].mxu1 }
 0x523   :  { %v2032_v2 = vsel %vm52_vm0, %v2553_v0, 0.0  ;;  %v1853_v3 = vpop.f32.mrb[19].mxu1 }
 0x524   :  { %v2033_v5 = vadd.f32 %v2032_v2, %v2031_v1  ;;  %v2025_v6 = vsel %vm52_vm0, %v1853_v3, 0.0 }
 0x525   :  { %v2026_v7 = vadd.f32 %v2025_v6, %v2024_v4 }
 0x526   :  { %v2558_v8 = vpop.f32.mrb[24].mxu0 }
 0x527   :  { %v2034_v9 = vsel %vm52_vm0, %v2558_v8, 0.0  ;;  %v1934_v10 = vpop.f32.mrb[25].mxu0 }
 0x528   :  { %v2035_v12 = vadd.f32 %v2034_v9, %v2033_v5  ;;  %v2027_v13 = vsel %vm52_vm0, %v1934_v10, 0.0 }
 0x529   :  { %v2028_v14 = vadd.f32 %v2027_v13, %v2026_v7 }
 0x52a   :  { %v2563_v15 = vpop.f32.mrb[20].mxu1 }
 0x52b   :  { %v2036_v16 = vsel %vm52_vm0, %v2563_v15, 0.0  ;;  %v2015_v17 = vpop.f32.mrb[21].mxu1 }
 0x52c   :  { %v2037_v18 = vadd.f32 %v2036_v16, %v2035_v12  ;;  %v2029_v19 = vsel %vm52_vm0, %v2015_v17, 0.0 }
 0x52d   :  { %v2030_v20 = vadd.f32 %v2029_v19, %v2028_v14 }
 0x52e   :  { %v2039_v33 = vadd.f32 %v2037_v18, %v2828_v23 }
 0x52f   :  { %v2038_v34 = vadd.f32 %v2030_v20, %v2795_v11  ;;  %v2067_v11 = vld [vmem:[%s3136_s4] sm:$0xff] }
 0x530   :  { %v2043_v21 = vsel %vm52_vm0, %v2039_v33, 0.0  ;;  %v2626_v30 = vpack.c.bf16 %v2068_v41, %v2067_v11 }
 0x531   :  { %2044 = vadd.xlane.f32.xlu1 %v2043_v21  ;;  %v2040_v22 = vsel %vm52_vm0, %v2038_v34, 0.0 }
 0x532   :  { %2041 = vadd.xlane.f32.xlu0 %v2040_v22  ;;  %2627 = vmatprep.subr.bf16.mxu0 %v2626_v30 }
 0x533   :  { %2629 = vmatpush3.bf16.msra.mxu0 %v2626_v30 }
 0x534   :  { %2631 = vmatprep.subr.bf16.mxu0 %v2630_v44 }
 0x537   :  { %2633 = vmatpush3.bf16.msra.mxu0 %v2630_v44 }
 0x5be   :  { %v2045_v24 = vpop.xlane.xlu1 %2044 }
 0x5bf   :  { %v2048_v25 = vmul.f32 0.03125, %v2045_v24  ;;  %v2042_v35 = vpop.xlane.xlu0 %2041 }
 0x5c0   :  { %v2047_v36 = vmul.f32 0.03125, %v2042_v35 }
 0x5c1   :  { %v2050_v37 = vsub.f32 %v2039_v33, %v2048_v25 }
 0x5c2   :  { %v2049_v38 = vsub.f32 %v2038_v34, %v2047_v36 }
 0x5c3   :  { %v2052_v29 = vmul.f32 %v2050_v37, %v2050_v37 }
 0x5c4   :  { %v2051_v39 = vmul.f32 %v2049_v38, %v2049_v38 }
 0x5c5   :  { %v2056_v23 = vsel %vm52_vm0, %v2052_v29, 0.0 }
 0x5c6   :  { %v2053_v40 = vsel %vm52_vm0, %v2051_v39, 0.0 }
 0x5c7   :  { %2054 = vadd.xlane.f32.xlu0 %v2053_v40 }
 0x5cb   :  { %2057 = vadd.xlane.f32.xlu0 %v2056_v23 }
 0x654   :  { %v2055_v32 = vpop.xlane.xlu0 %2054 }
 0x655   :  { %v2059_v50 = vmul.f32 0.03125, %v2055_v32 }
 0x657   :  { %v2061_v51 = vadd.f32 1e-05, %v2059_v50 }
 0x658   :  { %v2058_v52 = vpop.xlane.xlu0 %2057 }
 0x659   :  { %2689 = vrsqrt.f32 %v2061_v51  ;;  %v2060_v53 = vmul.f32 0.03125, %v2058_v52 }
 0x65b   :  { %v2062_v54 = vadd.f32 1e-05, %v2060_v53 }
 0x65d   :  { %2691 = vrsqrt.f32 %v2062_v54 }
 0x663   :  { %v2690_v55 = vpop.eup %2689 }
 0x664   :  { %v2065_v56 = vmul.f32 %v2690_v55, %v2049_v38 }
 0x666   :  { %2572 = vmatprep.mubr.msk.f32.mxu0 %vm52_vm0, %v2065_v56 }
 0x667   :  { %v2692_v57 = vpop.eup %2691 }
 0x668   :  { %v2066_v58 = vmul.f32 %v2692_v57, %v2050_v37 }
 0x66a   :  { %2573 = vmatmul.mubr.msk.f32.vlgmr.msra.gmra.mrb[26].mxu0 %vm52_vm0, %v2066_v58 }
 0x73d   :  { %v2574_v62 = vpop.f32.mrb[26].mxu0 }
 0x73e   :  { %v2143_v63 = vpop.f32.mrb[27].mxu0  ;;  %v2153_v1 = vmax.f32 %v2574_v62, 0.0 }
 0x73f   :  { %v2152_v0 = vmax.f32 %v2143_v63, 0.0 }
 0x741   :  { %2591 = vmatprep.mubr.msk.f32.mxu1 %vm2162_vm3, %v2152_v0 }
 0x742   :  { %2592 = vmatmul.mubr.msk.f32.vlgmr.msra.gmra.mrb[22].mxu1 %vm2162_vm3, %v2153_v1 }
 0x815   :  { %v2593_v2 = vpop.f32.mrb[22].mxu1 }
 0x816   :  { %v2241_v3 = vadd.f32 %v2593_v2, %v2066_v58  ;;  %v2235_v4 = vpop.f32.mrb[23].mxu1 }
 0x817   :  { %v2236_v5 = vadd.f32 %v2235_v4, %v2065_v56 }
 0x818   :  { %v2247_v6 = vsel %vm52_vm0, %v2241_v3, 0.0 }
 0x819   :  { %2248 = vadd.xlane.f32.xlu0 %v2247_v6  ;;  %v2244_v7 = vsel %vm52_vm0, %v2236_v5, 0.0 }
 0x81a   :  { %2245 = vadd.xlane.f32.xlu1 %v2244_v7 }
 0x8a6   :  { %v2249_v8 = vpop.xlane.xlu0 %2248 }
 0x8a7   :  { %v2251_v9 = vmul.f32 0.03125, %v2249_v8  ;;  %v2246_v10 = vpop.xlane.xlu1 %2245 }
 0x8a8   :  { %v2250_v12 = vmul.f32 0.03125, %v2246_v10 }
 0x8a9   :  { %v2253_v13 = vsub.f32 %v2241_v3, %v2251_v9 }
 0x8aa   :  { %v2252_v14 = vsub.f32 %v2236_v5, %v2250_v12 }
 0x8ab   :  { %v2255_v15 = vmul.f32 %v2253_v13, %v2253_v13 }
 0x8ac   :  { %v2254_v16 = vmul.f32 %v2252_v14, %v2252_v14 }
 0x8ad   :  { %v2259_v17 = vsel %vm52_vm0, %v2255_v15, 0.0 }
 0x8ae   :  { %2260 = vadd.xlane.f32.xlu0 %v2259_v17  ;;  %v2256_v18 = vsel %vm52_vm0, %v2254_v16, 0.0 }
 0x8af   :  { %2257 = vadd.xlane.f32.xlu1 %v2256_v18 }
 0x93b   :  { %v2261_v19 = vpop.xlane.xlu0 %2260 }
 0x93c   :  { %v2263_v20 = vmul.f32 0.03125, %v2261_v19  ;;  %v2258_v33 = vpop.xlane.xlu1 %2257 }
 0x93d   :  { %v2262_v34 = vmul.f32 0.03125, %v2258_v33 }
 0x93e   :  { %v2265_v21 = vadd.f32 1e-05, %v2263_v20 }
 0x93f   :  { %v2264_v22 = vadd.f32 1e-05, %v2262_v34 }
 0x940   :  { %2693 = vrsqrt.f32 %v2265_v21 }
 0x941   :  { %2695 = vrsqrt.f32 %v2264_v22 }
 0x94a   :  { %v2694_v24 = vpop.eup %2693 }
 0x94b   :  { %v2696_v25 = vpop.eup %2695  ;;  %v2269_v35 = vmul.f32 %v2694_v24, %v2253_v13 }
 0x94c   :  { %v2268_v36 = vmul.f32 %v2696_v25, %v2252_v14 }
 0x94d   :  { %2271 = vst.msk [vmem:[#allocation2 + $0x8] sm:$0xff] %vm52_vm0, %v2269_v35 }
 0x94e   :  { %2270 = vst.msk [vmem:[#allocation2] sm:$0xff] %vm52_vm0, %v2268_v36 }
 0x94f   :  { %2708 = shalt.err (!%p2705_p4)
}
 0x950   :  { %s2709_s26 = scalar_lea.hbm %s3138_s6, 256 }
 0x951   :  { %p2710_p5 = scmp.ne.s32.totalorder %s3138_s6, %s2709_s26  ;;  %p2713_p6 = scmp.lt.u32.totalorder %s2709_s26, %s3138_s6 }
 0x953   :  { %p2715_p7 = pnand %p2713_p6, %p2710_p5 }
 0x955   :  { %2718 = shalt.err (!%p2715_p7)
}
 0x956   :  { %s2726_s1 = smov 128   ;;  %s2727_s30 = smov 8  }
 0x957   :  { %2283 = dma.vmem_to_hbm [thread:$0]  %s2278_s23, 256, %s3138_s6, [#allocation3], %s2726_s1, %s2726_s1, %s2727_s30  }
 0x958   :  { %2719 = dma.done.wait [#allocation3], 256  }
 0x959   :  { %2720 = vsyncadd [#allocation3], 4294967040 }
 0x95a   :  { %2291 = vsyncpa [#allocation3], 1 }

// kernel: encoder_forward.2
= control target key start
LH: loop header
LB: loop body
LE: loop exit
PB: predicated region body
PF: predicated region fallthrough
CT: control target
= control target key end

     0   :  { %vm51_vm0 = vcmask 261120   ;;  %v2681_v26 = vmov 0.0   ;;  %vm2682_vm1 = vmmov 0   ;;  %vm369_vm2 = vcmask 64512   ;;  %s2684_s29 = smov 112   ;;  %s3083_s2 = inlined_call_operand.vmem [shape: f32[4,32,24], index: 2, kind: input, shape index: {}]   ;;  %s3084_s0 = inlined_call_operand.vmem [shape: f32[16,32], index: 0, kind: input, shape index: {}]   ;;  %s3085_s1 = inlined_call_operand.vmem [shape: f32[8,8,8], index: 1, kind: input, shape index: {}]   ;;  %s3086_s7 = inlined_call_operand.vmem [shape: f32[8,8,8], index: 7, kind: output, shape index: {1}]   ;;  %s3087_s3 = inlined_call_operand.vmem [shape: f32[4,8,32], index: 3, kind: input, shape index: {}]   ;;  %s3088_s4 = inlined_call_operand.vmem [shape: f32[32,64], index: 4, kind: input, shape index: {}]   ;;  %s3089_s5 = inlined_call_operand.vmem [shape: f32[64,32], index: 5, kind: input, shape index: {}]   ;;  %s3090_s6 = inlined_call_operand.vmem [shape: f32[16,32], index: 6, kind: output, shape index: {0}]  }
   0x1   :  { %v35_v0 = vld [vmem:[%s3083_s2] sm:$0xff]  ;;  %v36_v1 = vld [vmem:[%s3083_s2 + $0x8] sm:$0xff]  ;;  %v37_v5 = vld [vmem:[%s3083_s2 + $0x10] sm:$0xff]  ;;  %vm2161_vm3 = vcmask 523264  }
   0x2   :  { %v39_v2 = vld [vmem:[%s3083_s2 + $0x20] sm:$0xff]  ;;  %v2581_v3 = vpack.c.bf16 %v36_v1, %v35_v0  ;;  %v40_v4 = vld [vmem:[%s3083_s2 + $0x28] sm:$0xff]  ;;  %v38_v6 = vld [vmem:[%s3083_s2 + $0x18] sm:$0xff] }
   0x3   :  { %v2589_v7 = vpack.c.bf16 %v40_v4, %v39_v2  ;;  %v2585_v8 = vpack.c.bf16 %v38_v6, %v37_v5  ;;  %v41_v9 = vld [vmem:[%s3083_s2 + $0x30] sm:$0xff]  ;;  %v42_v10 = vld [vmem:[%s3083_s2 + $0x38] sm:$0xff]  ;;  %v2752_v11 = vld [vmem:[%s3084_s0] sm:$0xff] }
   0x4   :  { %2582 = vmatprep.subr.bf16.mxu0 %v2581_v3  ;;  %v2593_v12 = vpack.c.bf16 %v42_v10, %v41_v9  ;;  %2415 = vmatprep.mubr.msk.f32.mxu0 %vm51_vm0, %v2752_v11  ;;  %v43_v13 = vld [vmem:[%s3083_s2 + $0x40] sm:$0xff]  ;;  %v44_v14 = vld [vmem:[%s3083_s2 + $0x48] sm:$0xff]  ;;  %v45_v18 = vld [vmem:[%s3083_s2 + $0x50] sm:$0xff] }
   0x5   :  { %2590 = vmatprep.subr.bf16.mxu1 %v2589_v7  ;;  %2584 = vmatpush3.bf16.msra.mxu0 %v2581_v3  ;;  %v47_v15 = vld [vmem:[%s3083_s2 + $0x60] sm:$0xff]  ;;  %v2597_v16 = vpack.c.bf16 %v44_v14, %v43_v13  ;;  %v48_v17 = vld [vmem:[%s3083_s2 + $0x68] sm:$0xff]  ;;  %v46_v19 = vld [vmem:[%s3083_s2 + $0x58] sm:$0xff] }
   0x6   :  { %2592 = vmatpush3.bf16.msra.mxu1 %v2589_v7  ;;  %2586 = vmatprep.subr.bf16.mxu0 %v2585_v8  ;;  %v2605_v20 = vpack.c.bf16 %v48_v17, %v47_v15  ;;  %v49_v21 = vld [vmem:[%s3083_s2 + $0x70] sm:$0xff]  ;;  %v50_v22 = vld [vmem:[%s3083_s2 + $0x78] sm:$0xff]  ;;  %v2785_v23 = vld [vmem:[%s3084_s0 + $0x8] sm:$0xff]  ;;  %v2601_v24 = vpack.c.bf16 %v46_v19, %v45_v18  ;;  %s2683_s0 = smov 120  }
   0x7   :  { %2594 = vmatprep.subr.bf16.mxu1 %v2593_v12  ;;  %2426 = vmatprep.mubr.msk.f32.mxu1 %vm51_vm0, %v2752_v11  ;;  %v2609_v25 = vpack.c.bf16 %v50_v22, %v49_v21  ;;  %v27_v51 = vld [vmem:[%s3085_s1] sm:$0xff]  ;;  %v28_v55 = vld [vmem:[%s3085_s1 + $0x8] sm:$0xff]  ;;  %v29_v62 = vld [vmem:[%s3085_s1 + $0x10] sm:$0xff] }
   0x8   :  { %v30_v0 = vld [vmem:[%s3085_s1 + $0x18] sm:$0xff]  ;;  %v31_v6 = vld [vmem:[%s3085_s1 + $0x20] sm:$0xff]  ;;  %v32_v9 = vld [vmem:[%s3085_s1 + $0x28] sm:$0xff] }
   0x9   :  { %2588 = vmatpush3.bf16.msra.mxu0 %v2585_v8 }
   0xa   :  { %2596 = vmatpush3.bf16.msra.mxu1 %v2593_v12  ;;  %2598 = vmatprep.subr.bf16.mxu0 %v2597_v16 }
   0xb   :  { %2606 = vmatprep.subr.bf16.mxu1 %v2605_v20 }
   0xc   :  { %2416 = vmatmul.mubr.msk.f32.vlgmr.msra.gmra.mrb[0].mxu0 %vm51_vm0, %v2785_v23 }
   0xd   :  { %2427 = vmatmul.mubr.msk.f32.vlgmr.msra.gmra.mrb[0].mxu1 %vm51_vm0, %v2785_v23  ;;  %2600 = vmatpush3.bf16.msra.mxu0 %v2597_v16  ;;  %v33_v16 = vld [vmem:[%s3085_s1 + $0x30] sm:$0xff] }
   0xe   :  { %2602 = vmatprep.subr.bf16.mxu0 %v2601_v24  ;;  %2608 = vmatpush3.bf16.msra.mxu1 %v2605_v20  ;;  %v34_v20 = vld [vmem:[%s3085_s1 + $0x38] sm:$0xff] }
   0xf   :  { %2437 = vmatprep.mubr.msk.f32.mxu0 %vm51_vm0, %v2752_v11  ;;  %2610 = vmatprep.subr.bf16.mxu1 %v2609_v25 }
  0x10   :  { %2448 = vmatprep.mubr.msk.f32.mxu1 %vm51_vm0, %v2752_v11 }
  0x11   :  { %2604 = vmatpush3.bf16.msra.mxu0 %v2601_v24 }
  0x12   :  { %2612 = vmatpush3.bf16.msra.mxu1 %v2609_v25  ;;  %2451 = vmatprep.subr.mxu0 %v2681_v26 }
  0x13   :  { %2466 = vmatprep.subr.mxu1 %v2681_v26 }
  0x14   :  { %2438 = vmatmul.mubr.msk.f32.vlgmr.msra.gmra.mrb[2].mxu0 %vm51_vm0, %v2785_v23 }
  0x15   :  { %2449 = vmatmul.mubr.msk.f32.vlgmr.msra.gmra.mrb[2].mxu1 %vm51_vm0, %v2785_v23  ;;  %2453 = vmatprep.mubr.msk.f32.mxu0 %vm2682_vm1, %v2681_v26 }
  0x16   :  { %2468 = vmatprep.mubr.msk.f32.mxu1 %vm2682_vm1, %v2681_v26 }
  0xdf   :  { %v2805_v27 = vpop.f32.mrb[0].mxu0 }
  0xe0   :  { %v2807_v28 = vpop.f32.mrb[0].mxu1  ;;  %v2809_v29 = vpop.f32.mrb[1].mxu0  ;;  %v359_v40 = vmul.f32 0.35355338, %v2805_v27 }
  0xe1   :  { %v2811_v30 = vpop.f32.mrb[1].mxu1  ;;  %367 = vrot.lane.b32.xlu0 %v2809_v29, %s2683_s0  ;;  %v358_v37 = vmul.f32 0.35355338, %v2809_v29  ;;  %v361_v41 = vmul.f32 0.35355338, %v2807_v28 }
  0xe2   :  { %524 = vrot.lane.b32.xlu1 %v2811_v30, %s2683_s0  ;;  %v360_v44 = vmul.f32 0.35355338, %v2811_v30 }
  0xe5   :  { %446 = vrot.lane.b32.xlu0 %v2805_v27, %s2683_s0 }
  0xe6   :  { %602 = vrot.lane.b32.xlu1 %v2807_v28, %s2683_s0 }
  0xe7   :  { %v2817_v31 = vpop.f32.mrb[2].mxu0 }
  0xe8   :  { %v2819_v32 = vpop.f32.mrb[3].mxu0  ;;  %v2821_v33 = vpop.f32.mrb[2].mxu1  ;;  %v363_v45 = vmul.f32 0.35355338, %v2817_v31 }
  0xe9   :  { %680 = vrot.lane.b32.xlu0 %v2819_v32, %s2683_s0  ;;  %v2824_v34 = vpop.f32.mrb[3].mxu1  ;;  %v362_v47 = vmul.f32 0.35355338, %v2819_v32  ;;  %v365_v49 = vmul.f32 0.35355338, %v2821_v33 }
  0xea   :  { %758 = vrot.lane.b32.xlu1 %v2817_v31, %s2683_s0  ;;  %v364_v50 = vmul.f32 0.35355338, %v2824_v34 }
  0xed   :  { %836 = vrot.lane.b32.xlu0 %v2824_v34, %s2683_s0 }
  0xee   :  { %914 = vrot.lane.b32.xlu1 %v2821_v33, %s2683_s0 }
 0x153   :  { %v368_v35 = vpop.permute.xlu0 %367 }
 0x154   :  { %v525_v36 = vpop.permute.xlu1 %524  ;;  %2452 = vmatpush3.xpose.msk.msra.mxu0 %vm369_vm2, %v368_v35 }
 0x155   :  { %2456 = vmatprep.subr.mxu0 %v2681_v26 }
 0x157   :  { %v447_v38 = vpop.permute.xlu0 %446  ;;  %2454 = vmatmul.mubr.msk.f32.vlgmr.msra.gmra.mrb[4].mxu0 %vm369_vm2, %v358_v37 }
 0x158   :  { %v603_v39 = vpop.permute.xlu1 %602  ;;  %2457 = vmatpush3.xpose.msk.msra.mxu0 %vm369_vm2, %v447_v38  ;;  %2458 = vmatprep.mubr.msk.f32.mxu0 %vm2682_vm1, %v2681_v26 }
 0x159   :  { %2467 = vmatpush3.xpose.msk.msra.mxu1 %vm369_vm2, %v603_v39  ;;  %2461 = vmatprep.subr.mxu0 %v2681_v26 }
 0x15a   :  { %2476 = vmatprep.subr.mxu1 %v2681_v26 }
 0x15b   :  { %2459 = vmatmul.mubr.msk.f32.vlgmr.msra.gmra.mrb[6].mxu0 %vm369_vm2, %v359_v40  ;;  %v681_v42 = vpop.permute.xlu0 %680 }
 0x15c   :  { %2469 = vmatmul.mubr.msk.f32.vlgmr.msra.gmra.mrb[4].mxu1 %vm369_vm2, %v361_v41  ;;  %v759_v43 = vpop.permute.xlu1 %758  ;;  %2462 = vmatpush3.xpose.msk.msra.mxu0 %vm369_vm2, %v525_v36 }
 0x15d   :  { %2477 = vmatpush3.xpose.msk.msra.mxu1 %vm369_vm2, %v759_v43  ;;  %2463 = vmatprep.mubr.msk.f32.mxu0 %vm2682_vm1, %v2681_v26 }
 0x15e   :  { %2478 = vmatprep.mubr.msk.f32.mxu1 %vm2682_vm1, %v2681_v26  ;;  %2471 = vmatprep.subr.mxu0 %v2681_v26 }
 0x15f   :  { %2464 = vmatmul.mubr.msk.f32.vlgmr.msra.gmra.mrb[8].mxu0 %vm369_vm2, %v360_v44  ;;  %2486 = vmatprep.subr.mxu1 %v2681_v26  ;;  %v837_v48 = vpop.permute.xlu0 %836 }
 0x160   :  { %v915_v46 = vpop.permute.xlu1 %914  ;;  %2479 = vmatmul.mubr.msk.f32.vlgmr.msra.gmra.mrb[6].mxu1 %vm369_vm2, %v363_v45  ;;  %2472 = vmatpush3.xpose.msk.msra.mxu0 %vm369_vm2, %v681_v42 }
 0x161   :  { %2487 = vmatpush3.xpose.msk.msra.mxu1 %vm369_vm2, %v915_v46  ;;  %2473 = vmatprep.mubr.msk.f32.mxu0 %vm2682_vm1, %v2681_v26 }
 0x162   :  { %2488 = vmatprep.mubr.msk.f32.mxu1 %vm2682_vm1, %v2681_v26  ;;  %2481 = vmatprep.subr.mxu0 %v2681_v26 }
 0x163   :  { %2474 = vmatmul.mubr.msk.f32.vlgmr.msra.gmra.mrb[10].mxu0 %vm369_vm2, %v362_v47  ;;  %2496 = vmatprep.subr.mxu1 %v2681_v26 }
 0x164   :  { %2489 = vmatmul.mubr.msk.f32.vlgmr.msra.gmra.mrb[8].mxu1 %vm369_vm2, %v365_v49  ;;  %2482 = vmatpush3.xpose.msk.msra.mxu0 %vm369_vm2, %v837_v48 }
 0x165   :  { %2483 = vmatprep.mubr.msk.f32.mxu0 %vm2682_vm1, %v2681_v26  ;;  %2491 = vmatprep.subr.mxu0 %v2681_v26 }
 0x166   :  { %2498 = vmatprep.mubr.msk.f32.mxu1 %vm2682_vm1, %v2681_v26 }
 0x167   :  { %2484 = vmatmul.mubr.msk.f32.vlgmr.msra.gmra.mrb[12].mxu0 %vm369_vm2, %v364_v50 }
 0x168   :  { %2493 = vmatprep.mubr.msk.f32.mxu0 %vm2682_vm1, %v2681_v26 }
 0x22a   :  { %v441_v52 = vpop.f32.mrb[4].mxu0 }
 0x22b   :  { %v442_v53 = vadd.f32 %v441_v52, %v27_v51  ;;  %v2455_v54 = vpop.f32.mrb[5].mxu0 }
 0x22d   :  { %v991_v56 = vsel %vm369_vm2, %v442_v53, -inf }
 0x22e   :  { %992 = vmax.xlane.f32.xlu0 %v991_v56  ;;  %v519_v57 = vpop.f32.mrb[6].mxu0 }
 0x22f   :  { %v675_v58 = vpop.f32.mrb[4].mxu1  ;;  %v520_v59 = vadd.f32 %v519_v57, %v28_v55  ;;  %v2460_v60 = vpop.f32.mrb[7].mxu0 }
 0x230   :  { %v2470_v61 = vpop.f32.mrb[5].mxu1  ;;  %v676_v7 = vadd.f32 %v675_v58, %v30_v0 }
 0x231   :  { %v994_v63 = vsel %vm369_vm2, %v520_v59, -inf }
 0x232   :  { %995 = vmax.xlane.f32.xlu1 %v994_v63  ;;  %v597_v1 = vpop.f32.mrb[8].mxu0  ;;  %v1000_v18 = vsel %vm369_vm2, %v676_v7, -inf }
 0x233   :  { %v831_v2 = vpop.f32.mrb[6].mxu1  ;;  %v598_v3 = vadd.f32 %v597_v1, %v29_v62  ;;  %v2465_v4 = vpop.f32.mrb[9].mxu0 }
 0x234   :  { %v2480_v5 = vpop.f32.mrb[7].mxu1  ;;  %v832_v17 = vadd.f32 %v831_v2, %v32_v9 }
 0x235   :  { %v997_v8 = vsel %vm369_vm2, %v598_v3, -inf }
 0x236   :  { %998 = vmax.xlane.f32.xlu0 %v997_v8  ;;  %v753_v10 = vpop.f32.mrb[10].mxu0  ;;  %v1006_v35 = vsel %vm369_vm2, %v832_v17, -inf }
 0x237   :  { %v987_v12 = vpop.f32.mrb[8].mxu1  ;;  %v754_v13 = vadd.f32 %v753_v10, %v31_v6  ;;  %v2475_v14 = vpop.f32.mrb[11].mxu0 }
 0x238   :  { %v2490_v15 = vpop.f32.mrb[9].mxu1  ;;  %v988_v25 = vadd.f32 %v987_v12, %v34_v20 }
 0x239   :  { %v1003_v19 = vsel %vm369_vm2, %v754_v13, -inf }
 0x23a   :  { %1001 = vmax.xlane.f32.xlu0 %v1000_v18  ;;  %1004 = vmax.xlane.f32.xlu1 %v1003_v19  ;;  %v909_v21 = vpop.f32.mrb[12].mxu0  ;;  %v1012_v37 = vsel %vm369_vm2, %v988_v25, -inf }
 0x23b   :  { %v910_v22 = vadd.f32 %v909_v21, %v33_v16  ;;  %v2485_v24 = vpop.f32.mrb[13].mxu0 }
 0x23d   :  { %v1009_v36 = vsel %vm369_vm2, %v910_v22, -inf }
 0x23e   :  { %1007 = vmax.xlane.f32.xlu0 %v1006_v35  ;;  %1010 = vmax.xlane.f32.xlu1 %v1009_v36 }
 0x242   :  { %1013 = vmax.xlane.f32.xlu0 %v1012_v37 }
 0x24f   :  { %1087 = vrot.lane.b32.xlu1 %v2809_v29, %s2684_s29 }
 0x253   :  { %1239 = vrot.lane.b32.xlu1 %v2811_v30, %s2684_s29 }
 0x257   :  { %1315 = vrot.lane.b32.xlu1 %v2807_v28, %s2684_s29 }
 0x258   :  { %1163 = vrot.lane.b32.xlu0 %v2805_v27, %s2684_s29 }
 0x25b   :  { %1467 = vrot.lane.b32.xlu1 %v2817_v31, %s2684_s29 }
 0x25c   :  { %1391 = vrot.lane.b32.xlu0 %v2819_v32, %s2684_s29 }
 0x2bb   :  { %v993_v38 = vpop.xlane.xlu0 %992 }
 0x2bc   :  { %v1015_v39 = vsub.f32 %v442_v53, %v993_v38 }
 0x2be   :  { %v1023_v40 = vmul.f32 1.442695, %v1015_v39 }
 0x2bf   :  { %v996_v29 = vpop.xlane.xlu1 %995 }
 0x2c0   :  { %2641 = vpow2.f32 %v1023_v40  ;;  %v1016_v30 = vsub.f32 %v520_v59, %v996_v29 }
 0x2c2   :  { %v1025_v47 = vmul.f32 1.442695, %v1016_v30 }
 0x2c3   :  { %v999_v41 = vpop.xlane.xlu0 %998 }
 0x2c4   :  { %v1017_v42 = vsub.f32 %v598_v3, %v999_v41 }
 0x2c6   :  { %v1027_v43 = vmul.f32 1.442695, %v1017_v42 }
 0x2c7   :  { %v1002_v44 = vpop.xlane.xlu0 %1001  ;;  %v1005_v28 = vpop.xlane.xlu1 %1004 }
 0x2c8   :  { %2643 = vpow2.f32 %v1027_v43  ;;  %v1018_v45 = vsub.f32 %v676_v7, %v1002_v44  ;;  %v1019_v27 = vsub.f32 %v754_v13, %v1005_v28 }
 0x2ca   :  { %v2642_v46 = vpop.eup %2641  ;;  %v1029_v31 = vmul.f32 1.442695, %v1018_v45  ;;  %v1031_v48 = vmul.f32 1.442695, %v1019_v27  ;;  %v1695_v27 = vld [vmem:[%s3087_s3] sm:$0xff] }
 0x2cb   :  { %v1008_v49 = vpop.xlane.xlu0 %1007  ;;  %v1011_v32 = vpop.xlane.xlu1 %1010  ;;  %v1039_v50 = vsel %vm369_vm2, %v2642_v46, 0.0 }
 0x2cc   :  { %2645 = vpow2.f32 %v1029_v31  ;;  %v1020_v51 = vsub.f32 %v832_v17, %v1008_v49  ;;  %v1021_v52 = vsub.f32 %v910_v22, %v1011_v32  ;;  %1040 = vadd.xlane.f32.xlu1 %v1039_v50 }
 0x2cd   :  { %2647 = vpow2.f32 %v1031_v48 }
 0x2ce   :  { %2649 = vpow2.f32 %v1025_v47  ;;  %v1033_v53 = vmul.f32 1.442695, %v1020_v51  ;;  %v1035_v54 = vmul.f32 1.442695, %v1021_v52  ;;  %v1697_v47 = vld [vmem:[%s3087_s3 + $0x10] sm:$0xff] }
 0x2cf   :  { %v1014_v55 = vpop.xlane.xlu0 %1013  ;;  %v1088_v56 = vpop.permute.xlu1 %1087 }
 0x2d0   :  { %v1022_v57 = vsub.f32 %v988_v25, %v1014_v55  ;;  %2492 = vmatpush3.msra.mxu0 %v1088_v56  ;;  %2651 = vpow2.f32 %v1035_v54 }
 0x2d1   :  { %2501 = vmatprep.subr.mxu0 %v2681_v26  ;;  %2653 = vpow2.f32 %v1033_v53 }
 0x2d2   :  { %v2644_v58 = vpop.eup %2643  ;;  %v1037_v59 = vmul.f32 1.442695, %v1022_v57 }
 0x2d3   :  { %v1164_v60 = vpop.permute.xlu0 %1163  ;;  %v1045_v61 = vsel %vm369_vm2, %v2644_v58, 0.0  ;;  %v1240_v10 = vpop.permute.xlu1 %1239 }
 0x2d4   :  { %2497 = vmatpush3.msra.mxu1 %v1164_v60  ;;  %1046 = vadd.xlane.f32.xlu1 %v1045_v61  ;;  %2655 = vpow2.f32 %v1037_v59 }
 0x2d5   :  { %2506 = vmatprep.subr.mxu1 %v2681_v26 }
 0x2d6   :  { %v2646_v62 = vpop.eup %2645 }
 0x2d7   :  { %v2648_v63 = vpop.eup %2647  ;;  %v1048_v0 = vsel %vm369_vm2, %v2646_v62, 0.0  ;;  %v1316_v12 = vpop.permute.xlu1 %1315 }
 0x2d8   :  { %v2650_v1 = vpop.eup %2649  ;;  %1049 = vadd.xlane.f32.xlu0 %v1048_v0  ;;  %v1051_v2 = vsel %vm369_vm2, %v2648_v63, 0.0  ;;  %v1392_v15 = vpop.permute.xlu0 %1391 }
 0x2d9   :  { %1052 = vadd.xlane.f32.xlu1 %v1051_v2  ;;  %v1042_v4 = vsel %vm369_vm2, %v2650_v1, 0.0 }
 0x2da   :  { %v2652_v3 = vpop.eup %2651 }
 0x2db   :  { %v2928_v5 = vpop.eup %2653  ;;  %v1057_v6 = vsel %vm369_vm2, %v2652_v3, 0.0  ;;  %v1468_v13 = vpop.permute.xlu1 %1467 }
 0x2dc   :  { %1043 = vadd.xlane.f32.xlu0 %v1042_v4  ;;  %v1054_v7 = vsel %vm369_vm2, %v2928_v5, 0.0 }
 0x2dd   :  { %1058 = vadd.xlane.f32.xlu1 %v1057_v6 }
 0x2de   :  { %v2933_v8 = vpop.eup %2655 }
 0x2df   :  { %v1060_v9 = vsel %vm369_vm2, %v2933_v8, 0.0 }
 0x2e0   :  { %1055 = vadd.xlane.f32.xlu0 %v1054_v7 }
 0x2e4   :  { %1061 = vadd.xlane.f32.xlu0 %v1060_v9 }
 0x2ee   :  { %1619 = vrot.lane.b32.xlu1 %v2821_v33, %s2684_s29 }
 0x2fa   :  { %1543 = vrot.lane.b32.xlu0 %v2824_v34, %s2684_s29 }
 0x359   :  { %v1041_v14 = vpop.xlane.xlu1 %1040 }
 0x35a   :  { %2657 = vrcp.f32 %v1041_v14 }
 0x361   :  { %v1047_v16 = vpop.xlane.xlu1 %1046 }
 0x362   :  { %2659 = vrcp.f32 %v1047_v16 }
 0x364   :  { %v2658_v17 = vpop.eup %2657 }
 0x365   :  { %v1071_v18 = vmul.f32 %v2658_v17, %v2642_v46  ;;  %v1050_v19 = vpop.xlane.xlu0 %1049  ;;  %v1696_v46 = vld [vmem:[%s3087_s3 + $0x8] sm:$0xff] }
 0x366   :  { %2661 = vrcp.f32 %v1050_v19  ;;  %v1053_v20 = vpop.xlane.xlu1 %1052 }
 0x367   :  { %1079 = vst.msk [vmem:[%s3086_s7] sm:$0xff] %vm369_vm2, %v1071_v18  ;;  %2663 = vrcp.f32 %v1053_v20  ;;  %2494 = vmatmul.mubr.msk.f32.vlgmr.msra.gmra.mrb[14].mxu0 %vm369_vm2, %v1071_v18 }
 0x368   :  { %2502 = vmatpush3.msra.mxu0 %v1240_v10  ;;  %2503 = vmatprep.mubr.msk.f32.mxu0 %vm2682_vm1, %v2681_v26 }
 0x369   :  { %v1044_v33 = vpop.xlane.xlu0 %1043  ;;  %2511 = vmatprep.subr.mxu0 %v2681_v26 }
 0x36a   :  { %2665 = vrcp.f32 %v1044_v33  ;;  %v1059_v34 = vpop.xlane.xlu1 %1058 }
 0x36b   :  { %2667 = vrcp.f32 %v1059_v34 }
 0x36c   :  { %v2660_v21 = vpop.eup %2659 }
 0x36d   :  { %v1073_v22 = vmul.f32 %v2660_v21, %v2644_v58  ;;  %v1056_v24 = vpop.xlane.xlu0 %1055 }
 0x36e   :  { %2669 = vrcp.f32 %v1056_v24  ;;  %v1620_v45 = vpop.permute.xlu1 %1619 }
 0x36f   :  { %1081 = vst.msk [vmem:[%s3086_s7 + $0x10] sm:$0xff] %vm369_vm2, %v1073_v22  ;;  %2504 = vmatmul.mubr.msk.f32.vlgmr.msra.gmra.mrb[16].mxu0 %vm369_vm2, %v1073_v22 }
 0x370   :  { %v2662_v25 = vpop.eup %2661  ;;  %2512 = vmatpush3.msra.mxu0 %v1392_v15  ;;  %2513 = vmatprep.mubr.msk.f32.mxu0 %vm2682_vm1, %v2681_v26 }
 0x371   :  { %v2664_v35 = vpop.eup %2663  ;;  %v1074_v36 = vmul.f32 %v2662_v25, %v2646_v62  ;;  %v1062_v37 = vpop.xlane.xlu0 %1061  ;;  %2521 = vmatprep.subr.mxu0 %v2681_v26 }
 0x372   :  { %v1075_v38 = vmul.f32 %v2664_v35, %v2648_v63  ;;  %2671 = vrcp.f32 %v1062_v37 }
 0x373   :  { %1082 = vst.msk [vmem:[%s3086_s7 + $0x18] sm:$0xff] %vm369_vm2, %v1074_v36 }
 0x374   :  { %v2666_v39 = vpop.eup %2665  ;;  %1083 = vst.msk [vmem:[%s3086_s7 + $0x20] sm:$0xff] %vm369_vm2, %v1075_v38  ;;  %2514 = vmatmul.mubr.msk.f32.vlgmr.msra.gmra.mrb[18].mxu0 %vm369_vm2, %v1075_v38 }
 0x375   :  { %v2668_v40 = vpop.eup %2667  ;;  %v1072_v29 = vmul.f32 %v2666_v39, %v2650_v1  ;;  %v1544_v41 = vpop.permute.xlu0 %1543  ;;  %2523 = vmatprep.mubr.msk.f32.mxu0 %vm2682_vm1, %v2681_v26 }
 0x376   :  { %v1077_v42 = vmul.f32 %v2668_v40, %v2652_v3  ;;  %2522 = vmatpush3.msra.mxu0 %v1544_v41  ;;  %v2067_v41 = vld [vmem:[%s3088_s4 + $0x8] sm:$0xff] }
 0x377   :  { %1080 = vst.msk [vmem:[%s3086_s7 + $0x8] sm:$0xff] %vm369_vm2, %v1072_v29  ;;  %2499 = vmatmul.mubr.msk.f32.vlgmr.msra.gmra.mrb[10].mxu1 %vm369_vm2, %v1072_v29  ;;  %2531 = vmatprep.subr.mxu0 %v1695_v27 }
 0x378   :  { %v2670_v30 = vpop.eup %2669  ;;  %1085 = vst.msk [vmem:[%s3086_s7 + $0x30] sm:$0xff] %vm369_vm2, %v1077_v42  ;;  %2507 = vmatpush3.msra.mxu1 %v1316_v12  ;;  %2524 = vmatmul.mubr.msk.f32.vlgmr.msra.gmra.mrb[20].mxu0 %vm369_vm2, %v1077_v42  ;;  %v2068_v42 = vld [vmem:[%s3088_s4 + $0x10] sm:$0xff] }
 0x379   :  { %v1076_v43 = vmul.f32 %v2670_v30, %v2928_v5  ;;  %2508 = vmatprep.mubr.msk.f32.mxu1 %vm2682_vm1, %v2681_v26  ;;  %2516 = vmatprep.subr.mxu1 %v2681_v26 }
 0x37a   :  { %2532 = vmatpush3.msra.mxu0 %v1695_v27  ;;  %v2155_v27 = vld [vmem:[%s3089_s5 + $0x10] sm:$0xff] }
 0x37b   :  { %1084 = vst.msk [vmem:[%s3086_s7 + $0x28] sm:$0xff] %vm369_vm2, %v1076_v43  ;;  %2509 = vmatmul.mubr.msk.f32.vlgmr.msra.gmra.mrb[12].mxu1 %vm369_vm2, %v1074_v36  ;;  %2541 = vmatprep.subr.mxu0 %v1697_v47 }
 0x37c   :  { %v2672_v44 = vpop.eup %2671  ;;  %2517 = vmatpush3.msra.mxu1 %v1468_v13  ;;  %2518 = vmatprep.mubr.msk.f32.mxu1 %vm2682_vm1, %v2681_v26 }
 0x37d   :  { %v1078_v28 = vmul.f32 %v2672_v44, %v2933_v8  ;;  %2526 = vmatprep.subr.mxu1 %v2681_v26 }
 0x37f   :  { %1086 = vst.msk [vmem:[%s3086_s7 + $0x38] sm:$0xff] %vm369_vm2, %v1078_v28  ;;  %2519 = vmatmul.mubr.msk.f32.vlgmr.msra.gmra.mrb[14].mxu1 %vm369_vm2, %v1076_v43  ;;  %v2069_v43 = vld [vmem:[%s3088_s4 + $0x18] sm:$0xff] }
 0x380   :  { %2527 = vmatpush3.msra.mxu1 %v1620_v45  ;;  %2528 = vmatprep.mubr.msk.f32.mxu1 %vm2682_vm1, %v2681_v26  ;;  %v1698_v26 = vld [vmem:[%s3087_s3 + $0x18] sm:$0xff]  ;;  %v2617_v44 = vpack.c.bf16 %v2069_v43, %v2068_v42  ;;  %v2154_v45 = vld [vmem:[%s3089_s5 + $0x8] sm:$0xff] }
 0x381   :  { %2536 = vmatprep.subr.mxu1 %v1696_v46 }
 0x383   :  { %2529 = vmatmul.mubr.msk.f32.vlgmr.msra.gmra.mrb[16].mxu1 %vm369_vm2, %v1078_v28  ;;  %v2153_v28 = vld [vmem:[%s3089_s5] sm:$0xff] }
 0x384   :  { %2537 = vmatpush3.msra.mxu1 %v1696_v46  ;;  %v2621_v46 = vpack.c.bf16 %v2154_v45, %v2153_v28 }
 0x385   :  { %2546 = vmatprep.subr.mxu1 %v1698_v26 }
 0x43a   :  { %v1159_v31 = vpop.f32.mrb[14].mxu0 }
 0x43b   :  { %v2495_v48 = vpop.f32.mrb[15].mxu0  ;;  %2533 = vmatprep.mubr.msk.f32.mxu0 %vm369_vm2, %v1159_v31  ;;  %v2157_v31 = vld [vmem:[%s3089_s5 + $0x20] sm:$0xff] }
 0x43c   :  { %v2158_v48 = vld [vmem:[%s3089_s5 + $0x28] sm:$0xff] }
 0x442   :  { %v1311_v49 = vpop.f32.mrb[16].mxu0 }
 0x443   :  { %v2505_v32 = vpop.f32.mrb[17].mxu0  ;;  %2538 = vmatprep.mubr.msk.f32.mxu1 %vm369_vm2, %v1311_v49  ;;  %v2629_v49 = vpack.c.bf16 %v2158_v48, %v2157_v31 }
 0x447   :  { %v1463_v50 = vpop.f32.mrb[18].mxu0 }
 0x448   :  { %v2515_v51 = vpop.f32.mrb[19].mxu0 }
 0x44a   :  { %v1235_v52 = vpop.f32.mrb[10].mxu1 }
 0x44b   :  { %v1615_v53 = vpop.f32.mrb[20].mxu0  ;;  %v2500_v54 = vpop.f32.mrb[11].mxu1  ;;  %2534 = vmatmul.mubr.msk.f32.vlgmr.msra.gmra.mrb[22].mxu0 %vm369_vm2, %v1235_v52 }
 0x44c   :  { %v2525_v55 = vpop.f32.mrb[21].mxu0  ;;  %2543 = vmatprep.mubr.msk.f32.mxu0 %vm369_vm2, %v1463_v50  ;;  %2542 = vmatpush3.msra.mxu0 %v1697_v47  ;;  %v2156_v47 = vld [vmem:[%s3089_s5 + $0x18] sm:$0xff] }
 0x44e   :  { %v1387_v56 = vpop.f32.mrb[12].mxu1 }
 0x44f   :  { %v2510_v57 = vpop.f32.mrb[13].mxu1  ;;  %2539 = vmatmul.mubr.msk.f32.vlgmr.msra.gmra.mrb[18].mxu1 %vm369_vm2, %v1387_v56 }
 0x450   :  { %2548 = vmatprep.mubr.msk.f32.mxu1 %vm369_vm2, %v1615_v53  ;;  %2547 = vmatpush3.msra.mxu1 %v1698_v26  ;;  %v2625_v26 = vpack.c.bf16 %v2156_v47, %v2155_v27 }
 0x451   :  { %2622 = vmatprep.subr.bf16.mxu1 %v2621_v46 }
 0x452   :  { %v1539_v58 = vpop.f32.mrb[14].mxu1 }
 0x453   :  { %v2520_v59 = vpop.f32.mrb[15].mxu1  ;;  %2544 = vmatmul.mubr.msk.f32.vlgmr.msra.gmra.mrb[24].mxu0 %vm369_vm2, %v1539_v58 }
 0x454   :  { %v2159_v59 = vld [vmem:[%s3089_s5 + $0x30] sm:$0xff] }
 0x456   :  { %v1691_v60 = vpop.f32.mrb[16].mxu1 }
 0x457   :  { %v2530_v61 = vpop.f32.mrb[17].mxu1  ;;  %2549 = vmatmul.mubr.msk.f32.vlgmr.msra.gmra.mrb[20].mxu1 %vm369_vm2, %v1691_v60  ;;  %v2160_v60 = vld [vmem:[%s3089_s5 + $0x38] sm:$0xff] }
 0x458   :  { %2624 = vmatpush3.bf16.msra.mxu1 %v2621_v46  ;;  %v2633_v61 = vpack.c.bf16 %v2160_v60, %v2159_v59 }
 0x459   :  { %2626 = vmatprep.subr.bf16.mxu1 %v2625_v26 }
 0x45c   :  { %2628 = vmatpush3.bf16.msra.mxu1 %v2625_v26 }
 0x45d   :  { %2630 = vmatprep.subr.bf16.mxu1 %v2629_v49 }
 0x460   :  { %2632 = vmatpush3.bf16.msra.mxu1 %v2629_v49 }
 0x461   :  { %2634 = vmatprep.subr.bf16.mxu1 %v2633_v61 }
 0x464   :  { %2636 = vmatpush3.bf16.msra.mxu1 %v2633_v61 }
 0x51e   :  { %v2535_v62 = vpop.f32.mrb[22].mxu0 }
 0x51f   :  { %v1771_v63 = vpop.f32.mrb[23].mxu0  ;;  %v2030_v1 = vsel %vm51_vm0, %v2535_v62, 0.0 }
 0x520   :  { %v2023_v4 = vsel %vm51_vm0, %v1771_v63, 0.0 }
 0x522   :  { %v2540_v0 = vpop.f32.mrb[18].mxu1 }
 0x523   :  { %v2031_v2 = vsel %vm51_vm0, %v2540_v0, 0.0  ;;  %v1852_v3 = vpop.f32.mrb[19].mxu1 }
 0x524   :  { %v2032_v5 = vadd.f32 %v2031_v2, %v2030_v1  ;;  %v2024_v6 = vsel %vm51_vm0, %v1852_v3, 0.0 }
 0x525   :  { %v2025_v7 = vadd.f32 %v2024_v6, %v2023_v4 }
 0x526   :  { %v2545_v8 = vpop.f32.mrb[24].mxu0 }
 0x527   :  { %v2033_v9 = vsel %vm51_vm0, %v2545_v8, 0.0  ;;  %v1933_v10 = vpop.f32.mrb[25].mxu0 }
 0x528   :  { %v2034_v12 = vadd.f32 %v2033_v9, %v2032_v5  ;;  %v2026_v13 = vsel %vm51_vm0, %v1933_v10, 0.0 }
 0x529   :  { %v2027_v14 = vadd.f32 %v2026_v13, %v2025_v7 }
 0x52a   :  { %v2550_v15 = vpop.f32.mrb[20].mxu1 }
 0x52b   :  { %v2035_v16 = vsel %vm51_vm0, %v2550_v15, 0.0  ;;  %v2014_v17 = vpop.f32.mrb[21].mxu1 }
 0x52c   :  { %v2036_v18 = vadd.f32 %v2035_v16, %v2034_v12  ;;  %v2028_v19 = vsel %vm51_vm0, %v2014_v17, 0.0 }
 0x52d   :  { %v2029_v20 = vadd.f32 %v2028_v19, %v2027_v14 }
 0x52e   :  { %v2038_v33 = vadd.f32 %v2036_v18, %v2785_v23 }
 0x52f   :  { %v2037_v34 = vadd.f32 %v2029_v20, %v2752_v11  ;;  %v2066_v11 = vld [vmem:[%s3088_s4] sm:$0xff] }
 0x530   :  { %v2042_v21 = vsel %vm51_vm0, %v2038_v33, 0.0  ;;  %v2613_v30 = vpack.c.bf16 %v2067_v41, %v2066_v11 }
 0x531   :  { %2043 = vadd.xlane.f32.xlu1 %v2042_v21  ;;  %v2039_v22 = vsel %vm51_vm0, %v2037_v34, 0.0 }
 0x532   :  { %2040 = vadd.xlane.f32.xlu0 %v2039_v22  ;;  %2614 = vmatprep.subr.bf16.mxu0 %v2613_v30 }
 0x533   :  { %2616 = vmatpush3.bf16.msra.mxu0 %v2613_v30 }
 0x534   :  { %2618 = vmatprep.subr.bf16.mxu0 %v2617_v44 }
 0x537   :  { %2620 = vmatpush3.bf16.msra.mxu0 %v2617_v44 }
 0x5be   :  { %v2044_v24 = vpop.xlane.xlu1 %2043 }
 0x5bf   :  { %v2047_v25 = vmul.f32 0.03125, %v2044_v24  ;;  %v2041_v35 = vpop.xlane.xlu0 %2040 }
 0x5c0   :  { %v2046_v36 = vmul.f32 0.03125, %v2041_v35 }
 0x5c1   :  { %v2049_v37 = vsub.f32 %v2038_v33, %v2047_v25 }
 0x5c2   :  { %v2048_v38 = vsub.f32 %v2037_v34, %v2046_v36 }
 0x5c3   :  { %v2051_v29 = vmul.f32 %v2049_v37, %v2049_v37 }
 0x5c4   :  { %v2050_v39 = vmul.f32 %v2048_v38, %v2048_v38 }
 0x5c5   :  { %v2055_v23 = vsel %vm51_vm0, %v2051_v29, 0.0 }
 0x5c6   :  { %v2052_v40 = vsel %vm51_vm0, %v2050_v39, 0.0 }
 0x5c7   :  { %2053 = vadd.xlane.f32.xlu0 %v2052_v40 }
 0x5cb   :  { %2056 = vadd.xlane.f32.xlu0 %v2055_v23 }
 0x654   :  { %v2054_v32 = vpop.xlane.xlu0 %2053 }
 0x655   :  { %v2058_v50 = vmul.f32 0.03125, %v2054_v32 }
 0x657   :  { %v2060_v51 = vadd.f32 1e-05, %v2058_v50 }
 0x658   :  { %v2057_v52 = vpop.xlane.xlu0 %2056 }
 0x659   :  { %2673 = vrsqrt.f32 %v2060_v51  ;;  %v2059_v53 = vmul.f32 0.03125, %v2057_v52 }
 0x65b   :  { %v2061_v54 = vadd.f32 1e-05, %v2059_v53 }
 0x65d   :  { %2675 = vrsqrt.f32 %v2061_v54 }
 0x663   :  { %v2674_v55 = vpop.eup %2673 }
 0x664   :  { %v2064_v56 = vmul.f32 %v2674_v55, %v2048_v38 }
 0x666   :  { %2559 = vmatprep.mubr.msk.f32.mxu0 %vm51_vm0, %v2064_v56 }
 0x667   :  { %v2676_v57 = vpop.eup %2675 }
 0x668   :  { %v2065_v58 = vmul.f32 %v2676_v57, %v2049_v37 }
 0x66a   :  { %2560 = vmatmul.mubr.msk.f32.vlgmr.msra.gmra.mrb[26].mxu0 %vm51_vm0, %v2065_v58 }
 0x73d   :  { %v2561_v62 = vpop.f32.mrb[26].mxu0 }
 0x73e   :  { %v2142_v63 = vpop.f32.mrb[27].mxu0  ;;  %v2152_v1 = vmax.f32 %v2561_v62, 0.0 }
 0x73f   :  { %v2151_v0 = vmax.f32 %v2142_v63, 0.0 }
 0x741   :  { %2578 = vmatprep.mubr.msk.f32.mxu1 %vm2161_vm3, %v2151_v0 }
 0x742   :  { %2579 = vmatmul.mubr.msk.f32.vlgmr.msra.gmra.mrb[22].mxu1 %vm2161_vm3, %v2152_v1 }
 0x815   :  { %v2580_v2 = vpop.f32.mrb[22].mxu1 }
 0x816   :  { %v2240_v3 = vadd.f32 %v2580_v2, %v2065_v58  ;;  %v2234_v4 = vpop.f32.mrb[23].mxu1 }
 0x817   :  { %v2235_v5 = vadd.f32 %v2234_v4, %v2064_v56 }
 0x818   :  { %v2246_v6 = vsel %vm51_vm0, %v2240_v3, 0.0 }
 0x819   :  { %2247 = vadd.xlane.f32.xlu0 %v2246_v6  ;;  %v2243_v7 = vsel %vm51_vm0, %v2235_v5, 0.0 }
 0x81a   :  { %2244 = vadd.xlane.f32.xlu1 %v2243_v7 }
 0x8a6   :  { %v2248_v8 = vpop.xlane.xlu0 %2247 }
 0x8a7   :  { %v2250_v9 = vmul.f32 0.03125, %v2248_v8  ;;  %v2245_v10 = vpop.xlane.xlu1 %2244 }
 0x8a8   :  { %v2249_v12 = vmul.f32 0.03125, %v2245_v10 }
 0x8a9   :  { %v2252_v13 = vsub.f32 %v2240_v3, %v2250_v9 }
 0x8aa   :  { %v2251_v14 = vsub.f32 %v2235_v5, %v2249_v12 }
 0x8ab   :  { %v2254_v15 = vmul.f32 %v2252_v13, %v2252_v13 }
 0x8ac   :  { %v2253_v16 = vmul.f32 %v2251_v14, %v2251_v14 }
 0x8ad   :  { %v2258_v17 = vsel %vm51_vm0, %v2254_v15, 0.0 }
 0x8ae   :  { %2259 = vadd.xlane.f32.xlu0 %v2258_v17  ;;  %v2255_v18 = vsel %vm51_vm0, %v2253_v16, 0.0 }
 0x8af   :  { %2256 = vadd.xlane.f32.xlu1 %v2255_v18 }
 0x93b   :  { %v2260_v19 = vpop.xlane.xlu0 %2259 }
 0x93c   :  { %v2262_v20 = vmul.f32 0.03125, %v2260_v19  ;;  %v2257_v33 = vpop.xlane.xlu1 %2256 }
 0x93d   :  { %v2261_v34 = vmul.f32 0.03125, %v2257_v33 }
 0x93e   :  { %v2264_v21 = vadd.f32 1e-05, %v2262_v20 }
 0x93f   :  { %v2263_v22 = vadd.f32 1e-05, %v2261_v34 }
 0x940   :  { %2677 = vrsqrt.f32 %v2264_v21 }
 0x941   :  { %2679 = vrsqrt.f32 %v2263_v22 }
 0x94a   :  { %v2678_v24 = vpop.eup %2677 }
 0x94b   :  { %v2680_v25 = vpop.eup %2679  ;;  %v2268_v35 = vmul.f32 %v2678_v24, %v2252_v13 }
 0x94c   :  { %v2267_v36 = vmul.f32 %v2680_v25, %v2251_v14 }
 0x94d   :  { %2270 = vst.msk [vmem:[%s3090_s6 + $0x8] sm:$0xff] %vm51_vm0, %v2268_v35 }
 0x94e   :  { %2269 = vst.msk [vmem:[%s3090_s6] sm:$0xff] %vm51_vm0, %v2267_v36 }

</bundles_post_ra>
